<compile_context>
chip_gen: v5e
topology: v5e:2x2
jax: 0.10.0
libtpu: 0.0.40
codegen_flags: <defaults>
</compile_context>

<pallas_src>
import functools

import jax
import jax.numpy as jnp
from jax import lax
from jax.experimental import pallas as pl
from jax.experimental.pallas import tpu as pltpu

_SQRT1_2 = 0.7071067811865476


def _round_up(a, b):
    return (a + b - 1) // b * b


def _erf_approx(x):
    # Abramowitz & Stegun 7.1.26, |err| <= 1.5e-7 -> exact-GELU at f32 accuracy.
    a1, a2, a3, a4, a5 = 0.254829592, -0.284496736, 1.421413741, -1.453152027, 1.061405429
    pc = 0.3275911
    sgn = jnp.where(x >= 0.0, 1.0, -1.0)
    ax = jnp.abs(x)
    t = 1.0 / (1.0 + pc * ax)
    poly = ((((a5 * t + a4) * t + a3) * t + a2) * t + a1) * t
    return sgn * (1.0 - poly * jnp.exp(-ax * ax))


def _gelu(x):
    return 0.5 * x * (1.0 + _erf_approx(x * _SQRT1_2))


# ----------------------------- fused kernel ----------------------------------
def _compressor_kernel(xp_ref, w1_ref, wrow_ref, indt_ref,
                       g1_ref, b1_ref, g2_ref, b2_ref,
                       o_ref, z1_scr,
                       *, row_tile, n_rows, eps):
    i = pl.program_id(0)
    nsteps = pl.num_programs(0)

    # ---- stage 1 (per row tile): patchify conv == one folded MXU matmul ------
    start = pl.multiple_of(i * row_tile, row_tile)   # row_tile is 8-aligned
    z1_scr[pl.ds(start, row_tile), :] = jnp.dot(
        xp_ref[...], w1_ref[...], preferred_element_type=jnp.float32)

    # ---- last step: BN1 + GELU, grouped full-spatial conv, BN2 + GELU --------
    @pl.when(i == nsteps - 1)
    def _():
        z1 = z1_scr[...]                                    # (R1p, C2) f32
        c2 = z1.shape[1]

        # BatchNorm1 (training mode): stats over the *real* N*Hp*Wp rows only.
        rid = jax.lax.broadcasted_iota(jnp.int32, z1.shape, 0)
        valid = (rid < n_rows).astype(jnp.float32)
        cnt = float(n_rows)
        mean1 = jnp.sum(z1 * valid, axis=0, keepdims=True) / cnt
        cen = (z1 - mean1) * valid                           # centered -> no E[x^2]-E[x]^2 cancellation
        var1 = jnp.sum(cen * cen, axis=0, keepdims=True) / cnt
        y1 = _gelu((z1 - mean1) * jax.lax.rsqrt(var1 + eps) * g1_ref[...]
                   + b1_ref[...])                            # (R1p, C2)

        # stage 2: grouped conv with kernel == full remaining spatial extent.
        #   u[r, co]  = sum_ci y1[r, ci] * Wrow[ci, r, co]   (per-row C2->C2 mix)
        #   z2[n, :]  = sum of u over the rows of sample n   (one tiny matmul;
        #               padded rows carry zero weight / zero indicator)
        u = y1[:, 0:1] * wrow_ref[0]
        for ci in range(1, c2):                              # static loop, c2 = 2*in_ch (small)
            u = u + y1[:, ci:ci + 1] * wrow_ref[ci]
        z2 = jnp.dot(indt_ref[...], u, preferred_element_type=jnp.float32)  # (N, C2)

        # BatchNorm2 (training mode, stats over the batch) + GELU
        mean2 = jnp.mean(z2, axis=0, keepdims=True)
        var2 = jnp.mean((z2 - mean2) * (z2 - mean2), axis=0, keepdims=True)
        o_ref[...] = _gelu((z2 - mean2) * jax.lax.rsqrt(var2 + eps) * g2_ref[...]
                           + b2_ref[...])


# ------------------------------- wrapper --------------------------------------
def compressor_forward(x, params, row_tile=128):
    """x: (N, in_ch, H, W) f32 NCHW -> (N, 2*in_ch, 1, 1) f32 NCHW."""
    w1, g1, b1 = params["w1"], params["g1"], params["b1"]
    w2, g2, b2 = params["w2"], params["g2"], params["b2"]
    groups = params["groups"]

    N, cin, H, W = x.shape
    c2, _, p, _ = w1.shape                       # (C2, in_ch, patch, patch)
    hp, wp = H // p, W // p
    s = hp * wp                                  # spatial positions after patchify
    k1 = p * p * cin                             # stage-1 contraction width
    r1 = N * s                                   # stage-1 rows
    inpg = c2 // groups
    outpg = c2 // groups

    # row tiling: pad rows to a multiple of the 8-aligned tile
    tr = min(_round_up(max(row_tile, 8), 8), _round_up(r1, 8))
    r1p = _round_up(r1, tr)
    nsteps = r1p // tr

    # ---- patch extraction (im2col of the stride-p conv): pure data movement --
    x_nhwc = jnp.transpose(x, (0, 2, 3, 1))
    xp = (x_nhwc.reshape(N, hp, p, wp, p, cin)
                .transpose(0, 1, 3, 2, 4, 5)
                .reshape(r1, k1).astype(jnp.float32))
    xp = jnp.pad(xp, ((0, r1p - r1), (0, 0)))

    # ---- stage-1 weight as one (K1, C2) matrix --------------------------------
    w1m = jnp.transpose(w1, (2, 3, 1, 0)).reshape(k1, c2).astype(jnp.float32)

    # ---- stage-2 grouped weight, expanded per row (vectorised, no scatters) ---
    # w2e[s, ci, co] = w2[co, ci % inpg, s]  if group(ci) == group(co) else 0
    ci_idx = jnp.arange(c2)
    co_idx = jnp.arange(c2)
    same_group = ((ci_idx[:, None] // inpg) == (co_idx[None, :] // outpg)
                  ).astype(jnp.float32)                            # (C2, C2)
    w2_sc = jnp.transpose(w2, (2, 3, 1, 0)).reshape(s, inpg, c2)   # [s, ci_local, co]
    w2e = w2_sc[:, ci_idx % inpg, :] * same_group[None, :, :]      # (S, C2, C2)
    wrow = jnp.pad(jnp.tile(w2e, (N, 1, 1)),
                   ((0, r1p - r1), (0, 0), (0, 0)))                # (R1p, C2, C2)
    wrow = jnp.transpose(wrow, (1, 0, 2)).astype(jnp.float32)      # (C2, R1p, C2)

    # per-sample 0/1 row indicator; padded rows get an all-zero column
    indt = (jnp.arange(r1p)[None, :] // s == jnp.arange(N)[:, None]
            ).astype(jnp.float32)                                  # (N, R1p)

    kern = functools.partial(_compressor_kernel, row_tile=tr, n_rows=r1, eps=1e-5)

    out2 = pl.pallas_call(
        kern,
        out_shape=jax.ShapeDtypeStruct((N, c2), jnp.float32),
        grid_spec=pltpu.PrefetchScalarGridSpec(
            num_scalar_prefetch=0,
            grid=(nsteps,),
            in_specs=[
                pl.BlockSpec((tr, k1), lambda i: (i, 0)),           # xp: row-tiled, pipelined
                pl.BlockSpec((k1, c2), lambda i: (0, 0)),           # W1 (resident, fetched once)
                pl.BlockSpec((c2, r1p, c2), lambda i: (0, 0, 0)),   # stage-2 per-row weight
                pl.BlockSpec((N, r1p), lambda i: (0, 0)),           # per-sample indicator
                pl.BlockSpec((1, c2), lambda i: (0, 0)),            # gamma1
                pl.BlockSpec((1, c2), lambda i: (0, 0)),            # beta1
                pl.BlockSpec((1, c2), lambda i: (0, 0)),            # gamma2
                pl.BlockSpec((1, c2), lambda i: (0, 0)),            # beta2
            ],
            out_specs=pl.BlockSpec((N, c2), lambda i: (0, 0)),
            scratch_shapes=[pltpu.VMEM((r1p, c2), jnp.float32)],    # pre-BN stage-1 output
        ),
        compiler_params=pltpu.CompilerParams(
            # sequential: training-mode BN needs global row stats in the scratch
            dimension_semantics=("arbitrary",),
        ),
    )(xp, w1m, wrow, indt,
      g1.reshape(1, c2), b1.reshape(1, c2), g2.reshape(1, c2), b2.reshape(1, c2))

    return out2.reshape(N, c2, 1, 1)


# ----------------------- pure-JAX reference (for validation) ------------------
def _bn_gelu_ref(y, gamma, beta, eps=1e-5):
    mean = y.mean(axis=(0, 2, 3), keepdims=True)
    var = ((y - mean) ** 2).mean(axis=(0, 2, 3), keepdims=True)
    yh = (y - mean) / jnp.sqrt(var + eps) * gamma[None, :, None, None] \
        + beta[None, :, None, None]
    return 0.5 * yh * (1.0 + jax.lax.erf(yh * _SQRT1_2))


def reference_forward(x, params):
    w1, g1, b1 = params["w1"], params["g1"], params["b1"]
    w2, g2, b2 = params["w2"], params["g2"], params["b2"]
    groups = params["groups"]
    p = w1.shape[2]

    y = lax.conv_general_dilated(
        x, w1, (p, p), "VALID",
        dimension_numbers=("NCHW", "OIHW", "NCHW"),
        precision=lax.Precision.HIGHEST)
    y = _bn_gelu_ref(y, g1, b1)

    z = lax.conv_general_dilated(
        y, w2, (1, 1), "VALID",
        dimension_numbers=("NCHW", "OIHW", "NCHW"),
        feature_group_count=groups,
        precision=lax.Precision.HIGHEST)
    return _bn_gelu_ref(z, g2, b2)


if __name__ == "__main__":
    in_ch, H, W, patch = 4, 64, 64, 16           # module hyperparameters
    C2 = in_ch * 2
    N = 2

    key = jax.random.PRNGKey(0)
    kx, k1, k2, k3, k4 = jax.random.split(key, 5)
    x = jax.random.normal(kx, (N, in_ch, H, W), jnp.float32)
    params = {
        # Conv2d(in_ch, 2*in_ch, patch, stride=patch, bias=False) weight
        "w1": jax.random.normal(k1, (C2, in_ch, patch, patch), jnp.float32) * 0.05,
        "g1": 1.0 + 0.1 * jax.random.normal(k3, (C2,), jnp.float32),
        "b1": 0.1 * jax.random.normal(k4, (C2,), jnp.float32),
        # Conv2d(2*in_ch, 2*in_ch, (H//patch, W//patch), groups=in_ch, bias=False) weight
        "w2": jax.random.normal(k2, (C2, C2 // in_ch, H // patch, W // patch),
                                jnp.float32) * 0.2,
        "g2": jnp.ones((C2,), jnp.float32),
        "b2": jnp.zeros((C2,), jnp.float32),
        "groups": in_ch,
    }

    # row_tile=8 -> 4-step grid at this size, exercising the pipelined path.
    out = jax.block_until_ready(compressor_forward(x, params, row_tile=8))
    ref = jax.block_until_ready(reference_forward(x, params))

    assert out.shape == (N, C2, 1, 1), out.shape
    assert ref.shape == out.shape, (ref.shape, out.shape)
    max_err = float(jnp.max(jnp.abs(out - ref)))
    assert max_err < 2e-3, f"max abs err too large: {max_err}"
    print("KERNEL_OK")
</pallas_src>

<mosaic_0001>
module attributes {stable_mosaic.version = 11 : i64} {
  func.func @_compressor_kernel(%arg0: i32, %arg1: memref<8x1024xf32, #tpu.memory_space<vmem>>, %arg2: memref<1024x8xf32, #tpu.memory_space<vmem>>, %arg3: memref<8x32x8xf32, #tpu.memory_space<vmem>>, %arg4: memref<2x32xf32, #tpu.memory_space<vmem>>, %arg5: memref<1x8xf32, #tpu.memory_space<vmem>>, %arg6: memref<1x8xf32, #tpu.memory_space<vmem>>, %arg7: memref<1x8xf32, #tpu.memory_space<vmem>>, %arg8: memref<1x8xf32, #tpu.memory_space<vmem>>, %arg9: memref<2x8xf32, #tpu.memory_space<vmem>>, %arg10: memref<32x8xf32, #tpu.memory_space<vmem>>) attributes {dimension_semantics = [#tpu.dimension_semantics<arbitrary>], iteration_bounds = array<i64: 4>, scalar_prefetch = 0 : i64, scratch_operands = 1 : i64, tpu.core_type = #tpu.core_type<tc>, window_params = [{transform_indices = @transform_0, window_bounds = array<i64: 8, 1024>}, {pipeline_mode = #tpu.pipeline_mode<synchronous>, transform_indices = @transform_1, window_bounds = array<i64: 1024, 8>}, {pipeline_mode = #tpu.pipeline_mode<synchronous>, transform_indices = @transform_2, window_bounds = array<i64: 8, 32, 8>}, {pipeline_mode = #tpu.pipeline_mode<synchronous>, transform_indices = @transform_3, window_bounds = array<i64: 2, 32>}, {pipeline_mode = #tpu.pipeline_mode<synchronous>, transform_indices = @transform_4, window_bounds = array<i64: 1, 8>}, {pipeline_mode = #tpu.pipeline_mode<synchronous>, transform_indices = @transform_5, window_bounds = array<i64: 1, 8>}, {pipeline_mode = #tpu.pipeline_mode<synchronous>, transform_indices = @transform_6, window_bounds = array<i64: 1, 8>}, {pipeline_mode = #tpu.pipeline_mode<synchronous>, transform_indices = @transform_7, window_bounds = array<i64: 1, 8>}, {pipeline_mode = #tpu.pipeline_mode<synchronous>, transform_indices = @transform_8, window_bounds = array<i64: 2, 8>}]} {
    %c8_i32 = arith.constant 8 : i32
    %0 = arith.muli %arg0, %c8_i32 : i32
    %1 = tpu.assume_multiple %0, 8 : i32
    %c0 = arith.constant 0 : index
    %c0_0 = arith.constant 0 : index
    %2 = vector.load %arg1[%c0, %c0_0] : memref<8x1024xf32, #tpu.memory_space<vmem>>, vector<8x1024xf32>
    %c0_1 = arith.constant 0 : index
    %c0_2 = arith.constant 0 : index
    %3 = vector.load %arg2[%c0_1, %c0_2] : memref<1024x8xf32, #tpu.memory_space<vmem>>, vector<1024x8xf32>
    %cst = arith.constant dense<0.000000e+00> : vector<8x8xf32>
    %4 = tpu.matmul %2, %3, %cst {dimension_numbers = #tpu.dot_dimension_numbers<[1], [0], [0], [1], [0, 0, 1, 1], [], []>} : vector<8x1024xf32>, vector<1024x8xf32>, vector<8x8xf32> -> vector<8x8xf32>
    %5 = arith.index_cast %1 : i32 to index
    %c0_3 = arith.constant 0 : index
    %6 = vector.load %arg10[%5, %c0_3] : memref<32x8xf32, #tpu.memory_space<vmem>>, vector<8x8xf32>
    tpu.vector_store %arg10[%5, %c0_3], %4 {strides = array<i32>} : memref<32x8xf32, #tpu.memory_space<vmem>>, vector<8x8xf32>,
    %c3_i32 = arith.constant 3 : i32
    %7 = arith.cmpi eq, %arg0, %c3_i32 : i32
    %8 = arith.extui %7 : i1 to i32
    %c0_i32 = arith.constant 0 : i32
    %9 = arith.cmpi ne, %8, %c0_i32 : i32
    scf.if %9 {
      %c0_4 = arith.constant 0 : index
      %c0_5 = arith.constant 0 : index
      %10 = vector.load %arg10[%c0_4, %c0_5] : memref<32x8xf32, #tpu.memory_space<vmem>>, vector<32x8xf32>
      %11 = tpu.iota {dimensions = array<i32: 0>} : vector<32x8xi32>
      %c32_i32 = arith.constant 32 : i32
      %12 = vector.broadcast %c32_i32 : i32 to vector<32x8xi32>
      %13 = arith.cmpi slt, %11, %12 : vector<32x8xi32>
      %14 = arith.extui %13 : vector<32x8xi1> to vector<32x8xi32>
      %15 = arith.sitofp %14 : vector<32x8xi32> to vector<32x8xf32>
      %16 = arith.mulf %10, %15 : vector<32x8xf32>
      %cst_6 = arith.constant dense<0.000000e+00> : vector<8xf32>
      %17 = vector.multi_reduction <add>, %16, %cst_6 [0] : vector<32x8xf32> to vector<8xf32>
      %18 = vector.shape_cast %17 : vector<8xf32> to vector<1x8xf32>
      %cst_7 = arith.constant 3.200000e+01 : f32
      %19 = vector.broadcast %cst_7 : f32 to vector<1x8xf32>
      %20 = arith.divf %18, %19 : vector<1x8xf32>
      %21 = vector.broadcast %20 : vector<1x8xf32> to vector<32x8xf32>
      %22 = arith.subf %10, %21 : vector<32x8xf32>
      %23 = arith.mulf %22, %15 : vector<32x8xf32>
      %24 = arith.mulf %23, %23 : vector<32x8xf32>
      %cst_8 = arith.constant dense<0.000000e+00> : vector<8xf32>
      %25 = vector.multi_reduction <add>, %24, %cst_8 [0] : vector<32x8xf32> to vector<8xf32>
      %26 = vector.shape_cast %25 : vector<8xf32> to vector<1x8xf32>
      %cst_9 = arith.constant 3.200000e+01 : f32
      %27 = vector.broadcast %cst_9 : f32 to vector<1x8xf32>
      %28 = arith.divf %26, %27 : vector<1x8xf32>
      %29 = vector.broadcast %20 : vector<1x8xf32> to vector<32x8xf32>
      %30 = arith.subf %10, %29 : vector<32x8xf32>
      %cst_10 = arith.constant 9.99999974E-6 : f32
      %31 = vector.broadcast %cst_10 : f32 to vector<1x8xf32>
      %32 = arith.addf %28, %31 : vector<1x8xf32>
      %33 = math.rsqrt %32 : vector<1x8xf32>
      %34 = vector.broadcast %33 : vector<1x8xf32> to vector<32x8xf32>
      %35 = arith.mulf %30, %34 : vector<32x8xf32>
      %c0_11 = arith.constant 0 : index
      %c0_12 = arith.constant 0 : index
      %36 = vector.load %arg5[%c0_11, %c0_12] : memref<1x8xf32, #tpu.memory_space<vmem>>, vector<1x8xf32>
      %37 = vector.broadcast %36 : vector<1x8xf32> to vector<32x8xf32>
      %38 = arith.mulf %35, %37 : vector<32x8xf32>
      %c0_13 = arith.constant 0 : index
      %c0_14 = arith.constant 0 : index
      %39 = vector.load %arg6[%c0_13, %c0_14] : memref<1x8xf32, #tpu.memory_space<vmem>>, vector<1x8xf32>
      %40 = vector.broadcast %39 : vector<1x8xf32> to vector<32x8xf32>
      %41 = arith.addf %38, %40 : vector<32x8xf32>
      %cst_15 = arith.constant 5.000000e-01 : f32
      %42 = vector.broadcast %cst_15 : f32 to vector<32x8xf32>
      %43 = arith.mulf %42, %41 : vector<32x8xf32>
      %cst_16 = arith.constant 0.707106769 : f32
      %44 = vector.broadcast %cst_16 : f32 to vector<32x8xf32>
      %45 = arith.mulf %41, %44 : vector<32x8xf32>
      %cst_17 = arith.constant 0.000000e+00 : f32
      %46 = vector.broadcast %cst_17 : f32 to vector<32x8xf32>
      %47 = arith.cmpf oge, %45, %46 : vector<32x8xf32>
      %cst_18 = arith.constant 1.000000e+00 : f32
      %cst_19 = arith.constant -1.000000e+00 : f32
      %48 = vector.broadcast %cst_18 : f32 to vector<32x8xf32>
      %49 = vector.broadcast %cst_19 : f32 to vector<32x8xf32>
      %50 = arith.select %47, %48, %49 : vector<32x8xi1>, vector<32x8xf32>
      %51 = math.absf %45 : vector<32x8xf32>
      %cst_20 = arith.constant 0.327591091 : f32
      %52 = vector.broadcast %cst_20 : f32 to vector<32x8xf32>
      %53 = arith.mulf %52, %51 : vector<32x8xf32>
      %cst_21 = arith.constant 1.000000e+00 : f32
      %54 = vector.broadcast %cst_21 : f32 to vector<32x8xf32>
      %55 = arith.addf %54, %53 : vector<32x8xf32>
      %cst_22 = arith.constant 1.000000e+00 : f32
      %56 = vector.broadcast %cst_22 : f32 to vector<32x8xf32>
      %57 = arith.divf %56, %55 : vector<32x8xf32>
      %cst_23 = arith.constant 1.06140542 : f32
      %58 = vector.broadcast %cst_23 : f32 to vector<32x8xf32>
      %59 = arith.mulf %58, %57 : vector<32x8xf32>
      %cst_24 = arith.constant -1.45315206 : f32
      %60 = vector.broadcast %cst_24 : f32 to vector<32x8xf32>
      %61 = arith.addf %59, %60 : vector<32x8xf32>
      %62 = arith.mulf %61, %57 : vector<32x8xf32>
      %cst_25 = arith.constant 1.42141378 : f32
      %63 = vector.broadcast %cst_25 : f32 to vector<32x8xf32>
      %64 = arith.addf %62, %63 : vector<32x8xf32>
      %65 = arith.mulf %64, %57 : vector<32x8xf32>
      %cst_26 = arith.constant -0.284496725 : f32
      %66 = vector.broadcast %cst_26 : f32 to vector<32x8xf32>
      %67 = arith.addf %65, %66 : vector<32x8xf32>
      %68 = arith.mulf %67, %57 : vector<32x8xf32>
      %cst_27 = arith.constant 0.254829586 : f32
      %69 = vector.broadcast %cst_27 : f32 to vector<32x8xf32>
      %70 = arith.addf %68, %69 : vector<32x8xf32>
      %71 = arith.mulf %70, %57 : vector<32x8xf32>
      %cst_28 = arith.constant 0.000000e+00 : f32
      %72 = vector.broadcast %cst_28 : f32 to vector<32x8xf32>
      %73 = arith.subf %72, %51 : vector<32x8xf32>
      %74 = arith.mulf %73, %51 : vector<32x8xf32>
      %75 = math.exp %74 : vector<32x8xf32>
      %76 = arith.mulf %71, %75 : vector<32x8xf32>
      %cst_29 = arith.constant 1.000000e+00 : f32
      %77 = vector.broadcast %cst_29 : f32 to vector<32x8xf32>
      %78 = arith.subf %77, %76 : vector<32x8xf32>
      %79 = arith.mulf %50, %78 : vector<32x8xf32>
      %cst_30 = arith.constant 1.000000e+00 : f32
      %80 = vector.broadcast %cst_30 : f32 to vector<32x8xf32>
      %81 = arith.addf %80, %79 : vector<32x8xf32>
      %82 = arith.mulf %43, %81 : vector<32x8xf32>
      %83 = vector.extract_strided_slice %82 {offsets = [0, 0], sizes = [32, 1], strides = [1, 1]} : vector<32x8xf32> to vector<32x1xf32>
      %c0_31 = arith.constant 0 : index
      %c0_32 = arith.constant 0 : index
      %c0_33 = arith.constant 0 : index
      %84 = vector.load %arg3[%c0_31, %c0_32, %c0_33] : memref<8x32x8xf32, #tpu.memory_space<vmem>>, vector<1x32x8xf32>
      %85 = vector.shape_cast %84 : vector<1x32x8xf32> to vector<32x8xf32>
      %86 = vector.broadcast %83 : vector<32x1xf32> to vector<32x8xf32>
      %87 = arith.mulf %86, %85 : vector<32x8xf32>
      %88 = vector.extract_strided_slice %82 {offsets = [0, 1], sizes = [32, 1], strides = [1, 1]} : vector<32x8xf32> to vector<32x1xf32>
      %c1 = arith.constant 1 : index
      %c0_34 = arith.constant 0 : index
      %c0_35 = arith.constant 0 : index
      %89 = vector.load %arg3[%c1, %c0_34, %c0_35] : memref<8x32x8xf32, #tpu.memory_space<vmem>>, vector<1x32x8xf32>
      %90 = vector.shape_cast %89 : vector<1x32x8xf32> to vector<32x8xf32>
      %91 = vector.broadcast %88 : vector<32x1xf32> to vector<32x8xf32>
      %92 = arith.mulf %91, %90 : vector<32x8xf32>
      %93 = arith.addf %87, %92 : vector<32x8xf32>
      %94 = vector.extract_strided_slice %82 {offsets = [0, 2], sizes = [32, 1], strides = [1, 1]} : vector<32x8xf32> to vector<32x1xf32>
      %c2 = arith.constant 2 : index
      %c0_36 = arith.constant 0 : index
      %c0_37 = arith.constant 0 : index
      %95 = vector.load %arg3[%c2, %c0_36, %c0_37] : memref<8x32x8xf32, #tpu.memory_space<vmem>>, vector<1x32x8xf32>
      %96 = vector.shape_cast %95 : vector<1x32x8xf32> to vector<32x8xf32>
      %97 = vector.broadcast %94 : vector<32x1xf32> to vector<32x8xf32>
      %98 = arith.mulf %97, %96 : vector<32x8xf32>
      %99 = arith.addf %93, %98 : vector<32x8xf32>
      %100 = vector.extract_strided_slice %82 {offsets = [0, 3], sizes = [32, 1], strides = [1, 1]} : vector<32x8xf32> to vector<32x1xf32>
      %c3 = arith.constant 3 : index
      %c0_38 = arith.constant 0 : index
      %c0_39 = arith.constant 0 : index
      %101 = vector.load %arg3[%c3, %c0_38, %c0_39] : memref<8x32x8xf32, #tpu.memory_space<vmem>>, vector<1x32x8xf32>
      %102 = vector.shape_cast %101 : vector<1x32x8xf32> to vector<32x8xf32>
      %103 = vector.broadcast %100 : vector<32x1xf32> to vector<32x8xf32>
      %104 = arith.mulf %103, %102 : vector<32x8xf32>
      %105 = arith.addf %99, %104 : vector<32x8xf32>
      %106 = vector.extract_strided_slice %82 {offsets = [0, 4], sizes = [32, 1], strides = [1, 1]} : vector<32x8xf32> to vector<32x1xf32>
      %c4 = arith.constant 4 : index
      %c0_40 = arith.constant 0 : index
      %c0_41 = arith.constant 0 : index
      %107 = vector.load %arg3[%c4, %c0_40, %c0_41] : memref<8x32x8xf32, #tpu.memory_space<vmem>>, vector<1x32x8xf32>
      %108 = vector.shape_cast %107 : vector<1x32x8xf32> to vector<32x8xf32>
      %109 = vector.broadcast %106 : vector<32x1xf32> to vector<32x8xf32>
      %110 = arith.mulf %109, %108 : vector<32x8xf32>
      %111 = arith.addf %105, %110 : vector<32x8xf32>
      %112 = vector.extract_strided_slice %82 {offsets = [0, 5], sizes = [32, 1], strides = [1, 1]} : vector<32x8xf32> to vector<32x1xf32>
      %c5 = arith.constant 5 : index
      %c0_42 = arith.constant 0 : index
      %c0_43 = arith.constant 0 : index
      %113 = vector.load %arg3[%c5, %c0_42, %c0_43] : memref<8x32x8xf32, #tpu.memory_space<vmem>>, vector<1x32x8xf32>
      %114 = vector.shape_cast %113 : vector<1x32x8xf32> to vector<32x8xf32>
      %115 = vector.broadcast %112 : vector<32x1xf32> to vector<32x8xf32>
      %116 = arith.mulf %115, %114 : vector<32x8xf32>
      %117 = arith.addf %111, %116 : vector<32x8xf32>
      %118 = vector.extract_strided_slice %82 {offsets = [0, 6], sizes = [32, 1], strides = [1, 1]} : vector<32x8xf32> to vector<32x1xf32>
      %c6 = arith.constant 6 : index
      %c0_44 = arith.constant 0 : index
      %c0_45 = arith.constant 0 : index
      %119 = vector.load %arg3[%c6, %c0_44, %c0_45] : memref<8x32x8xf32, #tpu.memory_space<vmem>>, vector<1x32x8xf32>
      %120 = vector.shape_cast %119 : vector<1x32x8xf32> to vector<32x8xf32>
      %121 = vector.broadcast %118 : vector<32x1xf32> to vector<32x8xf32>
      %122 = arith.mulf %121, %120 : vector<32x8xf32>
      %123 = arith.addf %117, %122 : vector<32x8xf32>
      %124 = vector.extract_strided_slice %82 {offsets = [0, 7], sizes = [32, 1], strides = [1, 1]} : vector<32x8xf32> to vector<32x1xf32>
      %c7 = arith.constant 7 : index
      %c0_46 = arith.constant 0 : index
      %c0_47 = arith.constant 0 : index
      %125 = vector.load %arg3[%c7, %c0_46, %c0_47] : memref<8x32x8xf32, #tpu.memory_space<vmem>>, vector<1x32x8xf32>
      %126 = vector.shape_cast %125 : vector<1x32x8xf32> to vector<32x8xf32>
      %127 = vector.broadcast %124 : vector<32x1xf32> to vector<32x8xf32>
      %128 = arith.mulf %127, %126 : vector<32x8xf32>
      %129 = arith.addf %123, %128 : vector<32x8xf32>
      %c0_48 = arith.constant 0 : index
      %c0_49 = arith.constant 0 : index
      %130 = vector.load %arg4[%c0_48, %c0_49] : memref<2x32xf32, #tpu.memory_space<vmem>>, vector<2x32xf32>
      %cst_50 = arith.constant dense<0.000000e+00> : vector<2x8xf32>
      %131 = tpu.matmul %130, %129, %cst_50 {dimension_numbers = #tpu.dot_dimension_numbers<[1], [0], [0], [1], [0, 0, 1, 1], [], []>} : vector<2x32xf32>, vector<32x8xf32>, vector<2x8xf32> -> vector<2x8xf32>
      %cst_51 = arith.constant dense<0.000000e+00> : vector<8xf32>
      %132 = vector.multi_reduction <add>, %131, %cst_51 [0] : vector<2x8xf32> to vector<8xf32>
      %133 = vector.shape_cast %132 : vector<8xf32> to vector<1x8xf32>
      %cst_52 = arith.constant 2.000000e+00 : f32
      %134 = vector.broadcast %cst_52 : f32 to vector<1x8xf32>
      %135 = arith.divf %133, %134 : vector<1x8xf32>
      %136 = vector.broadcast %135 : vector<1x8xf32> to vector<2x8xf32>
      %137 = arith.subf %131, %136 : vector<2x8xf32>
      %138 = vector.broadcast %135 : vector<1x8xf32> to vector<2x8xf32>
      %139 = arith.subf %131, %138 : vector<2x8xf32>
      %140 = arith.mulf %137, %139 : vector<2x8xf32>
      %cst_53 = arith.constant dense<0.000000e+00> : vector<8xf32>
      %141 = vector.multi_reduction <add>, %140, %cst_53 [0] : vector<2x8xf32> to vector<8xf32>
      %142 = vector.shape_cast %141 : vector<8xf32> to vector<1x8xf32>
      %cst_54 = arith.constant 2.000000e+00 : f32
      %143 = vector.broadcast %cst_54 : f32 to vector<1x8xf32>
      %144 = arith.divf %142, %143 : vector<1x8xf32>
      %145 = vector.broadcast %135 : vector<1x8xf32> to vector<2x8xf32>
      %146 = arith.subf %131, %145 : vector<2x8xf32>
      %cst_55 = arith.constant 9.99999974E-6 : f32
      %147 = vector.broadcast %cst_55 : f32 to vector<1x8xf32>
      %148 = arith.addf %144, %147 : vector<1x8xf32>
      %149 = math.rsqrt %148 : vector<1x8xf32>
      %150 = vector.broadcast %149 : vector<1x8xf32> to vector<2x8xf32>
      %151 = arith.mulf %146, %150 : vector<2x8xf32>
      %c0_56 = arith.constant 0 : index
      %c0_57 = arith.constant 0 : index
      %152 = vector.load %arg7[%c0_56, %c0_57] : memref<1x8xf32, #tpu.memory_space<vmem>>, vector<1x8xf32>
      %153 = vector.broadcast %152 : vector<1x8xf32> to vector<2x8xf32>
      %154 = arith.mulf %151, %153 : vector<2x8xf32>
      %c0_58 = arith.constant 0 : index
      %c0_59 = arith.constant 0 : index
      %155 = vector.load %arg8[%c0_58, %c0_59] : memref<1x8xf32, #tpu.memory_space<vmem>>, vector<1x8xf32>
      %156 = vector.broadcast %155 : vector<1x8xf32> to vector<2x8xf32>
      %157 = arith.addf %154, %156 : vector<2x8xf32>
      %cst_60 = arith.constant 5.000000e-01 : f32
      %158 = vector.broadcast %cst_60 : f32 to vector<2x8xf32>
      %159 = arith.mulf %158, %157 : vector<2x8xf32>
      %cst_61 = arith.constant 0.707106769 : f32
      %160 = vector.broadcast %cst_61 : f32 to vector<2x8xf32>
      %161 = arith.mulf %157, %160 : vector<2x8xf32>
      %cst_62 = arith.constant 0.000000e+00 : f32
      %162 = vector.broadcast %cst_62 : f32 to vector<2x8xf32>
      %163 = arith.cmpf oge, %161, %162 : vector<2x8xf32>
      %cst_63 = arith.constant 1.000000e+00 : f32
      %cst_64 = arith.constant -1.000000e+00 : f32
      %164 = vector.broadcast %cst_63 : f32 to vector<2x8xf32>
      %165 = vector.broadcast %cst_64 : f32 to vector<2x8xf32>
      %166 = arith.select %163, %164, %165 : vector<2x8xi1>, vector<2x8xf32>
      %167 = math.absf %161 : vector<2x8xf32>
      %cst_65 = arith.constant 0.327591091 : f32
      %168 = vector.broadcast %cst_65 : f32 to vector<2x8xf32>
      %169 = arith.mulf %168, %167 : vector<2x8xf32>
      %cst_66 = arith.constant 1.000000e+00 : f32
      %170 = vector.broadcast %cst_66 : f32 to vector<2x8xf32>
      %171 = arith.addf %170, %169 : vector<2x8xf32>
      %cst_67 = arith.constant 1.000000e+00 : f32
      %172 = vector.broadcast %cst_67 : f32 to vector<2x8xf32>
      %173 = arith.divf %172, %171 : vector<2x8xf32>
      %cst_68 = arith.constant 1.06140542 : f32
      %174 = vector.broadcast %cst_68 : f32 to vector<2x8xf32>
      %175 = arith.mulf %174, %173 : vector<2x8xf32>
      %cst_69 = arith.constant -1.45315206 : f32
      %176 = vector.broadcast %cst_69 : f32 to vector<2x8xf32>
      %177 = arith.addf %175, %176 : vector<2x8xf32>
      %178 = arith.mulf %177, %173 : vector<2x8xf32>
      %cst_70 = arith.constant 1.42141378 : f32
      %179 = vector.broadcast %cst_70 : f32 to vector<2x8xf32>
      %180 = arith.addf %178, %179 : vector<2x8xf32>
      %181 = arith.mulf %180, %173 : vector<2x8xf32>
      %cst_71 = arith.constant -0.284496725 : f32
      %182 = vector.broadcast %cst_71 : f32 to vector<2x8xf32>
      %183 = arith.addf %181, %182 : vector<2x8xf32>
      %184 = arith.mulf %183, %173 : vector<2x8xf32>
      %cst_72 = arith.constant 0.254829586 : f32
      %185 = vector.broadcast %cst_72 : f32 to vector<2x8xf32>
      %186 = arith.addf %184, %185 : vector<2x8xf32>
      %187 = arith.mulf %186, %173 : vector<2x8xf32>
      %cst_73 = arith.constant 0.000000e+00 : f32
      %188 = vector.broadcast %cst_73 : f32 to vector<2x8xf32>
      %189 = arith.subf %188, %167 : vector<2x8xf32>
      %190 = arith.mulf %189, %167 : vector<2x8xf32>
      %191 = math.exp %190 : vector<2x8xf32>
      %192 = arith.mulf %187, %191 : vector<2x8xf32>
      %cst_74 = arith.constant 1.000000e+00 : f32
      %193 = vector.broadcast %cst_74 : f32 to vector<2x8xf32>
      %194 = arith.subf %193, %192 : vector<2x8xf32>
      %195 = arith.mulf %166, %194 : vector<2x8xf32>
      %cst_75 = arith.constant 1.000000e+00 : f32
      %196 = vector.broadcast %cst_75 : f32 to vector<2x8xf32>
      %197 = arith.addf %196, %195 : vector<2x8xf32>
      %198 = arith.mulf %159, %197 : vector<2x8xf32>
      %c0_76 = arith.constant 0 : index
      %c0_77 = arith.constant 0 : index
      %199 = vector.load %arg9[%c0_76, %c0_77] : memref<2x8xf32, #tpu.memory_space<vmem>>, vector<2x8xf32>
      tpu.vector_store %arg9[%c0_76, %c0_77], %198 {strides = array<i32>} : memref<2x8xf32, #tpu.memory_space<vmem>>, vector<2x8xf32>,
    } else {
    }
    return
  }
  func.func @transform_0(%arg0: i32) -> (i32, i32) {
    %c0_i32 = arith.constant 0 : i32
    %c0_i32_0 = arith.constant 0 : i32
    return %arg0, %c0_i32 : i32, i32
  }
  func.func @transform_1(%arg0: i32) -> (i32, i32) {
    %c0_i32 = arith.constant 0 : i32
    %c0_i32_0 = arith.constant 0 : i32
    %c0_i32_1 = arith.constant 0 : i32
    return %c0_i32, %c0_i32_0 : i32, i32
  }
  func.func @transform_2(%arg0: i32) -> (i32, i32, i32) {
    %c0_i32 = arith.constant 0 : i32
    %c0_i32_0 = arith.constant 0 : i32
    %c0_i32_1 = arith.constant 0 : i32
    %c0_i32_2 = arith.constant 0 : i32
    return %c0_i32, %c0_i32_0, %c0_i32_1 : i32, i32, i32
  }
  func.func @transform_3(%arg0: i32) -> (i32, i32) {
    %c0_i32 = arith.constant 0 : i32
    %c0_i32_0 = arith.constant 0 : i32
    %c0_i32_1 = arith.constant 0 : i32
    return %c0_i32, %c0_i32_0 : i32, i32
  }
  func.func @transform_4(%arg0: i32) -> (i32, i32) {
    %c0_i32 = arith.constant 0 : i32
    %c0_i32_0 = arith.constant 0 : i32
    %c0_i32_1 = arith.constant 0 : i32
    return %c0_i32, %c0_i32_0 : i32, i32
  }
  func.func @transform_5(%arg0: i32) -> (i32, i32) {
    %c0_i32 = arith.constant 0 : i32
    %c0_i32_0 = arith.constant 0 : i32
    %c0_i32_1 = arith.constant 0 : i32
    return %c0_i32, %c0_i32_0 : i32, i32
  }
  func.func @transform_6(%arg0: i32) -> (i32, i32) {
    %c0_i32 = arith.constant 0 : i32
    %c0_i32_0 = arith.constant 0 : i32
    %c0_i32_1 = arith.constant 0 : i32
    return %c0_i32, %c0_i32_0 : i32, i32
  }
  func.func @transform_7(%arg0: i32) -> (i32, i32) {
    %c0_i32 = arith.constant 0 : i32
    %c0_i32_0 = arith.constant 0 : i32
    %c0_i32_1 = arith.constant 0 : i32
    return %c0_i32, %c0_i32_0 : i32, i32
  }
  func.func @transform_8(%arg0: i32) -> (i32, i32) {
    %c0_i32 = arith.constant 0 : i32
    %c0_i32_0 = arith.constant 0 : i32
    %c0_i32_1 = arith.constant 0 : i32
    return %c0_i32, %c0_i32_0 : i32, i32
  }
}

</mosaic_0001>

<bundles_post_ra>
// kernel: tpu_custom_call.1
= control target key start
LH: loop header
LB: loop body
LE: loop exit
PB: predicated region body
PF: predicated region fallthrough
CT: control target
= control target key end

     0   :  { %13 = vsyncpa [#allocation4], 0  ;;  %s1477_s27 = smov 0   ;;  %s2161_s0 = inlined_call_operand.vmem [shape: f32[32,1024], index: 0, kind: input, shape index: {}]   ;;  %s2162_s1 = inlined_call_operand.vmem [shape: f32[1024,8], index: 1, kind: input, shape index: {}]   ;;  %s2163_s2 = inlined_call_operand.vmem [shape: f32[8,32,8], index: 2, kind: input, shape index: {}]   ;;  %s2164_s3 = inlined_call_operand.vmem [shape: f32[2,32], index: 3, kind: input, shape index: {}]   ;;  %s2165_s4 = inlined_call_operand.vmem [shape: f32[1,8], index: 4, kind: input, shape index: {}]   ;;  %s2166_s5 = inlined_call_operand.vmem [shape: f32[1,8], index: 5, kind: input, shape index: {}]   ;;  %s2167_s6 = inlined_call_operand.vmem [shape: f32[1,8], index: 6, kind: input, shape index: {}]   ;;  %s2168_s7 = inlined_call_operand.vmem [shape: f32[1,8], index: 7, kind: input, shape index: {}]   ;;  %s2169_s8 = inlined_call_operand.hbm [shape: f32[2,8], index: 8, kind: output, shape index: {}]  }
   0x1 LB: > { %s1483_s28 = sadd.s32 4294967295, %s1418_s27   ;;  %p1257_p0 = scmp.ge.s32.totalorder %s1418_s27, 1  ;;  %s1418_s27 = sphi %s1477_s27, %s19_s27  }
   0x2   : > { %p258_p1 = scmp.lt.s32.totalorder %s1418_s27, 5 }
   0x4   : > { %p259_p2 = pnand %p1257_p0, %p258_p1 }
   0x5   : > { %p287_p3 = scmp.lt.s32.totalorder (!%p259_p2), %s1483_s28, 3  ;;  %s1260_s10 = sshll.u32 (!%p259_p2), %s1483_s28, 3 }
   0x6   : > { %262 = sbr.rel (%p259_p2) target bundleno = 818 (0x332), region = 52  ;;  %p1261_p4 = scmp.ne.s32.totalorder (!%p259_p2), %s1483_s28, 3 }
   0xb   : > { %v316_v0 = vld [vmem:[%s2162_s1 + $0x78] sm:$0xff]  ;;  %v315_v2 = vld [vmem:[%s2162_s1 + $0x70] sm:$0xff]  ;;  %v314_v6 = vld [vmem:[%s2162_s1 + $0x68] sm:$0xff]  ;;  %s1755_s23 = scalar_select %p287_p3, %s1483_s28, 3  ;;  %vm590_vm0 = vcmask 64512  }
   0xc   : > { %v348_v1 = vld [vmem:[%s2162_s1 + $0x178] sm:$0xff]  ;;  %429 = vmatpush.msra.mxu0 %v316_v0  ;;  %v347_v4 = vld [vmem:[%s2162_s1 + $0x170] sm:$0xff]  ;;  %v346_v8 = vld [vmem:[%s2162_s1 + $0x168] sm:$0xff] }
   0xd   : > { %469 = vmatpush.msra.mxu2 %v348_v1  ;;  %v332_v3 = vld [vmem:[%s2162_s1 + $0xf8] sm:$0xff]  ;;  %v331_v7 = vld [vmem:[%s2162_s1 + $0xf0] sm:$0xff]  ;;  %v330_v10 = vld [vmem:[%s2162_s1 + $0xe8] sm:$0xff]  ;;  %s1295_s20 = sshll.u32 %s1755_s23, 6 }
   0xe   : > { %v364_v5 = vld [vmem:[%s2162_s1 + $0x1f8] sm:$0xff]  ;;  %449 = vmatpush.msra.mxu1 %v332_v3  ;;  %430 = vmatpush.msra.mxu0 %v315_v2  ;;  %v363_v9 = vld [vmem:[%s2162_s1 + $0x1f0] sm:$0xff]  ;;  %v313_v11 = vld [vmem:[%s2162_s1 + $0x60] sm:$0xff]  ;;  %s1803_s15 = scalar_lea.vmem %s2161_s0, %s1295_s20 }
   0xf   : > { %489 = vmatpush.msra.mxu3 %v364_v5  ;;  %470 = vmatpush.msra.mxu2 %v347_v4  ;;  %v345_v12 = vld [vmem:[%s2162_s1 + $0x160] sm:$0xff]  ;;  %v362_v13 = vld [vmem:[%s2162_s1 + $0x1e8] sm:$0xff]  ;;  %v312_v16 = vld [vmem:[%s2162_s1 + $0x58] sm:$0xff] }
  0x10   : > { %450 = vmatpush.msra.mxu1 %v331_v7  ;;  %431 = vmatpush.msra.mxu0 %v314_v6  ;;  %v329_v14 = vld [vmem:[%s2162_s1 + $0xe0] sm:$0xff]  ;;  %v344_v17 = vld [vmem:[%s2162_s1 + $0x158] sm:$0xff]  ;;  %v311_v20 = vld [vmem:[%s2162_s1 + $0x50] sm:$0xff] }
  0x11   : > { %490 = vmatpush.msra.mxu3 %v363_v9  ;;  %471 = vmatpush.msra.mxu2 %v346_v8  ;;  %v361_v15 = vld [vmem:[%s2162_s1 + $0x1e0] sm:$0xff]  ;;  %v328_v18 = vld [vmem:[%s2162_s1 + $0xd8] sm:$0xff]  ;;  %v343_v21 = vld [vmem:[%s2162_s1 + $0x150] sm:$0xff] }
  0x12   : > { %451 = vmatpush.msra.mxu1 %v330_v10  ;;  %432 = vmatpush.msra.mxu0 %v313_v11  ;;  %v360_v19 = vld [vmem:[%s2162_s1 + $0x1d8] sm:$0xff]  ;;  %v327_v22 = vld [vmem:[%s2162_s1 + $0xd0] sm:$0xff]  ;;  %v310_v24 = vld [vmem:[%s2162_s1 + $0x48] sm:$0xff] }
  0x13   : > { %491 = vmatpush.msra.mxu3 %v362_v13  ;;  %472 = vmatpush.msra.mxu2 %v345_v12  ;;  %v359_v23 = vld [vmem:[%s2162_s1 + $0x1d0] sm:$0xff]  ;;  %v342_v25 = vld [vmem:[%s2162_s1 + $0x148] sm:$0xff]  ;;  %v309_v28 = vld [vmem:[%s2162_s1 + $0x40] sm:$0xff] }
  0x14   : > { %452 = vmatpush.msra.mxu1 %v329_v14  ;;  %433 = vmatpush.msra.mxu0 %v312_v16  ;;  %v326_v26 = vld [vmem:[%s2162_s1 + $0xc8] sm:$0xff]  ;;  %v341_v29 = vld [vmem:[%s2162_s1 + $0x140] sm:$0xff]  ;;  %v308_v32 = vld [vmem:[%s2162_s1 + $0x38] sm:$0xff] }
  0x15   : > { %492 = vmatpush.msra.mxu3 %v361_v15  ;;  %473 = vmatpush.msra.mxu2 %v344_v17  ;;  %v358_v27 = vld [vmem:[%s2162_s1 + $0x1c8] sm:$0xff]  ;;  %v325_v30 = vld [vmem:[%s2162_s1 + $0xc0] sm:$0xff]  ;;  %v340_v33 = vld [vmem:[%s2162_s1 + $0x138] sm:$0xff] }
  0x16   : > { %453 = vmatpush.msra.mxu1 %v328_v18  ;;  %434 = vmatpush.msra.mxu0 %v311_v20  ;;  %v357_v31 = vld [vmem:[%s2162_s1 + $0x1c0] sm:$0xff]  ;;  %v324_v34 = vld [vmem:[%s2162_s1 + $0xb8] sm:$0xff]  ;;  %v307_v36 = vld [vmem:[%s2162_s1 + $0x30] sm:$0xff] }
  0x17   : > { %493 = vmatpush.msra.mxu3 %v360_v19  ;;  %474 = vmatpush.msra.mxu2 %v343_v21  ;;  %v356_v35 = vld [vmem:[%s2162_s1 + $0x1b8] sm:$0xff]  ;;  %v339_v37 = vld [vmem:[%s2162_s1 + $0x130] sm:$0xff]  ;;  %v306_v40 = vld [vmem:[%s2162_s1 + $0x28] sm:$0xff] }
  0x18   : > { %454 = vmatpush.msra.mxu1 %v327_v22  ;;  %435 = vmatpush.msra.mxu0 %v310_v24  ;;  %v323_v38 = vld [vmem:[%s2162_s1 + $0xb0] sm:$0xff]  ;;  %v338_v41 = vld [vmem:[%s2162_s1 + $0x128] sm:$0xff]  ;;  %v305_v44 = vld [vmem:[%s2162_s1 + $0x20] sm:$0xff] }
  0x19   : > { %494 = vmatpush.msra.mxu3 %v359_v23  ;;  %475 = vmatpush.msra.mxu2 %v342_v25  ;;  %v355_v39 = vld [vmem:[%s2162_s1 + $0x1b0] sm:$0xff]  ;;  %v322_v42 = vld [vmem:[%s2162_s1 + $0xa8] sm:$0xff]  ;;  %v337_v45 = vld [vmem:[%s2162_s1 + $0x120] sm:$0xff] }
  0x1a   : > { %455 = vmatpush.msra.mxu1 %v326_v26  ;;  %436 = vmatpush.msra.mxu0 %v309_v28  ;;  %v354_v43 = vld [vmem:[%s2162_s1 + $0x1a8] sm:$0xff]  ;;  %v321_v46 = vld [vmem:[%s2162_s1 + $0xa0] sm:$0xff]  ;;  %v304_v48 = vld [vmem:[%s2162_s1 + $0x18] sm:$0xff] }
  0x1b   : > { %495 = vmatpush.msra.mxu3 %v358_v27  ;;  %476 = vmatpush.msra.mxu2 %v341_v29  ;;  %v353_v47 = vld [vmem:[%s2162_s1 + $0x1a0] sm:$0xff]  ;;  %v336_v49 = vld [vmem:[%s2162_s1 + $0x118] sm:$0xff]  ;;  %v303_v52 = vld [vmem:[%s2162_s1 + $0x10] sm:$0xff] }
  0x1c   : > { %456 = vmatpush.msra.mxu1 %v325_v30  ;;  %437 = vmatpush.msra.mxu0 %v308_v32  ;;  %v320_v50 = vld [vmem:[%s2162_s1 + $0x98] sm:$0xff]  ;;  %v335_v53 = vld [vmem:[%s2162_s1 + $0x110] sm:$0xff]  ;;  %v302_v56 = vld [vmem:[%s2162_s1 + $0x8] sm:$0xff] }
  0x1d   : > { %496 = vmatpush.msra.mxu3 %v357_v31  ;;  %477 = vmatpush.msra.mxu2 %v340_v33  ;;  %v352_v51 = vld [vmem:[%s2162_s1 + $0x198] sm:$0xff]  ;;  %v319_v54 = vld [vmem:[%s2162_s1 + $0x90] sm:$0xff]  ;;  %v334_v57 = vld [vmem:[%s2162_s1 + $0x108] sm:$0xff] }
  0x1e   : > { %457 = vmatpush.msra.mxu1 %v324_v34  ;;  %438 = vmatpush.msra.mxu0 %v307_v36  ;;  %v351_v55 = vld [vmem:[%s2162_s1 + $0x190] sm:$0xff]  ;;  %v318_v58 = vld [vmem:[%s2162_s1 + $0x88] sm:$0xff]  ;;  %v301_v60 = vld [vmem:[%s2162_s1] sm:$0xff] }
  0x1f   : > { %497 = vmatpush.msra.mxu3 %v356_v35  ;;  %478 = vmatpush.msra.mxu2 %v339_v37  ;;  %v350_v59 = vld [vmem:[%s2162_s1 + $0x188] sm:$0xff]  ;;  %v333_v61 = vld [vmem:[%s2162_s1 + $0x100] sm:$0xff]  ;;  %v380_v62 = vld [vmem:[%s2162_s1 + $0x278] sm:$0xff] }
  0x20   : > { %458 = vmatpush.msra.mxu1 %v323_v38  ;;  %439 = vmatpush.msra.mxu0 %v306_v40  ;;  %v412_v63 = vld [vmem:[%s2162_s1 + $0x378] sm:$0xff]  ;;  %v317_v0 = vld [vmem:[%s2162_s1 + $0x80] sm:$0xff]  ;;  %v379_v2 = vld [vmem:[%s2162_s1 + $0x270] sm:$0xff] }
  0x21   : > { %498 = vmatpush.msra.mxu3 %v355_v39  ;;  %479 = vmatpush.msra.mxu2 %v338_v41  ;;  %v349_v1 = vld [vmem:[%s2162_s1 + $0x180] sm:$0xff]  ;;  %v396_v3 = vld [vmem:[%s2162_s1 + $0x2f8] sm:$0xff]  ;;  %v411_v4 = vld [vmem:[%s2162_s1 + $0x370] sm:$0xff] }
  0x22   : > { %459 = vmatpush.msra.mxu1 %v322_v42  ;;  %440 = vmatpush.msra.mxu0 %v305_v44  ;;  %v428_v5 = vld [vmem:[%s2162_s1 + $0x3f8] sm:$0xff]  ;;  %v378_v6 = vld [vmem:[%s2162_s1 + $0x268] sm:$0xff]  ;;  %v395_v7 = vld [vmem:[%s2162_s1 + $0x2f0] sm:$0xff] }
  0x23   : > { %499 = vmatpush.msra.mxu3 %v354_v43  ;;  %480 = vmatpush.msra.mxu2 %v337_v45  ;;  %v410_v8 = vld [vmem:[%s2162_s1 + $0x368] sm:$0xff]  ;;  %v427_v9 = vld [vmem:[%s2162_s1 + $0x3f0] sm:$0xff]  ;;  %v377_v10 = vld [vmem:[%s2162_s1 + $0x260] sm:$0xff] }
  0x24   : > { %460 = vmatpush.msra.mxu1 %v321_v46  ;;  %441 = vmatpush.msra.mxu0 %v304_v48  ;;  %v394_v11 = vld [vmem:[%s2162_s1 + $0x2e8] sm:$0xff]  ;;  %v409_v12 = vld [vmem:[%s2162_s1 + $0x360] sm:$0xff]  ;;  %v376_v14 = vld [vmem:[%s2162_s1 + $0x258] sm:$0xff] }
  0x25   : > { %500 = vmatpush.msra.mxu3 %v353_v47  ;;  %481 = vmatpush.msra.mxu2 %v336_v49  ;;  %v426_v13 = vld [vmem:[%s2162_s1 + $0x3e8] sm:$0xff]  ;;  %v393_v15 = vld [vmem:[%s2162_s1 + $0x2e0] sm:$0xff]  ;;  %v408_v16 = vld [vmem:[%s2162_s1 + $0x358] sm:$0xff] }
  0x26   : > { %461 = vmatpush.msra.mxu1 %v320_v50  ;;  %442 = vmatpush.msra.mxu0 %v303_v52  ;;  %v425_v17 = vld [vmem:[%s2162_s1 + $0x3e0] sm:$0xff]  ;;  %v375_v18 = vld [vmem:[%s2162_s1 + $0x250] sm:$0xff]  ;;  %v392_v19 = vld [vmem:[%s2162_s1 + $0x2d8] sm:$0xff] }
  0x27   : > { %501 = vmatpush.msra.mxu3 %v352_v51  ;;  %482 = vmatpush.msra.mxu2 %v335_v53  ;;  %v407_v20 = vld [vmem:[%s2162_s1 + $0x350] sm:$0xff]  ;;  %v424_v21 = vld [vmem:[%s2162_s1 + $0x3d8] sm:$0xff]  ;;  %v374_v22 = vld [vmem:[%s2162_s1 + $0x248] sm:$0xff] }
  0x28   : > { %462 = vmatpush.msra.mxu1 %v319_v54  ;;  %443 = vmatpush.msra.mxu0 %v302_v56  ;;  %v391_v23 = vld [vmem:[%s2162_s1 + $0x2d0] sm:$0xff]  ;;  %v406_v24 = vld [vmem:[%s2162_s1 + $0x348] sm:$0xff]  ;;  %v373_v26 = vld [vmem:[%s2162_s1 + $0x240] sm:$0xff] }
  0x29   : > { %502 = vmatpush.msra.mxu3 %v351_v55  ;;  %483 = vmatpush.msra.mxu2 %v334_v57  ;;  %v423_v25 = vld [vmem:[%s2162_s1 + $0x3d0] sm:$0xff]  ;;  %v390_v27 = vld [vmem:[%s2162_s1 + $0x2c8] sm:$0xff]  ;;  %v405_v28 = vld [vmem:[%s2162_s1 + $0x340] sm:$0xff] }
  0x2a   : > { %463 = vmatpush.msra.mxu1 %v318_v58  ;;  %444 = vmatpush.msra.mxu0 %v301_v60  ;;  %v422_v29 = vld [vmem:[%s2162_s1 + $0x3c8] sm:$0xff]  ;;  %v372_v30 = vld [vmem:[%s2162_s1 + $0x238] sm:$0xff]  ;;  %v389_v31 = vld [vmem:[%s2162_s1 + $0x2c0] sm:$0xff] }
  0x2b   : > { %503 = vmatpush.msra.mxu3 %v350_v59  ;;  %484 = vmatpush.msra.mxu2 %v333_v61  ;;  %v404_v32 = vld [vmem:[%s2162_s1 + $0x338] sm:$0xff]  ;;  %v421_v33 = vld [vmem:[%s2162_s1 + $0x3c0] sm:$0xff]  ;;  %v371_v34 = vld [vmem:[%s2162_s1 + $0x230] sm:$0xff] }
  0x2c   : > { %509 = vmatpush.msrb.mxu0 %v380_v62  ;;  %464 = vmatpush.msra.mxu1 %v317_v0  ;;  %v388_v35 = vld [vmem:[%s2162_s1 + $0x2b8] sm:$0xff]  ;;  %v403_v36 = vld [vmem:[%s2162_s1 + $0x330] sm:$0xff]  ;;  %v370_v38 = vld [vmem:[%s2162_s1 + $0x228] sm:$0xff] }
  0x2d   : > { %549 = vmatpush.msrb.mxu2 %v412_v63  ;;  %504 = vmatpush.msra.mxu3 %v349_v1  ;;  %v420_v37 = vld [vmem:[%s2162_s1 + $0x3b8] sm:$0xff]  ;;  %v387_v39 = vld [vmem:[%s2162_s1 + $0x2b0] sm:$0xff]  ;;  %v402_v40 = vld [vmem:[%s2162_s1 + $0x328] sm:$0xff] }
  0x2e   : > { %510 = vmatpush.msrb.mxu0 %v379_v2  ;;  %529 = vmatpush.msrb.mxu1 %v396_v3  ;;  %v419_v41 = vld [vmem:[%s2162_s1 + $0x3b0] sm:$0xff]  ;;  %v369_v43 = vld [vmem:[%s2162_s1 + $0x220] sm:$0xff]  ;;  %v386_v44 = vld [vmem:[%s2162_s1 + $0x2a8] sm:$0xff] }
  0x2f   : > { %550 = vmatpush.msrb.mxu2 %v411_v4  ;;  %569 = vmatpush.msrb.mxu3 %v428_v5  ;;  %v295_v42 = vld [vmem:[%s1803_s15 + $0x10] sm:$0xff]  ;;  %v401_v45 = vld [vmem:[%s2162_s1 + $0x320] sm:$0xff]  ;;  %v418_v46 = vld [vmem:[%s2162_s1 + $0x3a8] sm:$0xff] }
  0x30   : > { %511 = vmatpush.msrb.mxu0 %v378_v6  ;;  %530 = vmatpush.msrb.mxu1 %v395_v7  ;;  %v293_v47 = vld [vmem:[%s1803_s15] sm:$0xff]  ;;  %v296_v48 = vld [vmem:[%s1803_s15 + $0x18] sm:$0xff]  ;;  %v294_v53 = vld [vmem:[%s1803_s15 + $0x8] sm:$0xff] }
  0x31   : > { %551 = vmatpush.msrb.mxu2 %v410_v8  ;;  %570 = vmatpush.msrb.mxu3 %v427_v9  ;;  %v368_v49 = vld [vmem:[%s2162_s1 + $0x218] sm:$0xff]  ;;  %v385_v50 = vld [vmem:[%s2162_s1 + $0x2a0] sm:$0xff]  ;;  %v367_v54 = vld [vmem:[%s2162_s1 + $0x210] sm:$0xff] }
  0x32   : > { %512 = vmatpush.msrb.mxu0 %v377_v10  ;;  %531 = vmatpush.msrb.mxu1 %v394_v11  ;;  %v400_v51 = vld [vmem:[%s2162_s1 + $0x318] sm:$0xff]  ;;  %v417_v52 = vld [vmem:[%s2162_s1 + $0x3a0] sm:$0xff]  ;;  %v399_v56 = vld [vmem:[%s2162_s1 + $0x310] sm:$0xff] }
  0x33   : > { %552 = vmatpush.msrb.mxu2 %v409_v12  ;;  %571 = vmatpush.msrb.mxu3 %v426_v13  ;;  %v384_v55 = vld [vmem:[%s2162_s1 + $0x298] sm:$0xff]  ;;  %v366_v58 = vld [vmem:[%s2162_s1 + $0x208] sm:$0xff]  ;;  %v383_v59 = vld [vmem:[%s2162_s1 + $0x290] sm:$0xff] }
  0x34   : > { %513 = vmatpush.msrb.mxu0 %v376_v14  ;;  %532 = vmatpush.msrb.mxu1 %v393_v15  ;;  %v416_v57 = vld [vmem:[%s2162_s1 + $0x398] sm:$0xff]  ;;  %v398_v60 = vld [vmem:[%s2162_s1 + $0x308] sm:$0xff]  ;;  %v415_v61 = vld [vmem:[%s2162_s1 + $0x390] sm:$0xff] }
  0x35   : > { %553 = vmatpush.msrb.mxu2 %v408_v16  ;;  %572 = vmatpush.msrb.mxu3 %v425_v17  ;;  %v365_v62 = vld [vmem:[%s2162_s1 + $0x200] sm:$0xff]  ;;  %v382_v63 = vld [vmem:[%s2162_s1 + $0x288] sm:$0xff]  ;;  %v299_v3 = vld [vmem:[%s1803_s15 + $0x30] sm:$0xff] }
  0x36   : > { %514 = vmatpush.msrb.mxu0 %v375_v18  ;;  %533 = vmatpush.msrb.mxu1 %v392_v19  ;;  %v397_v0 = vld [vmem:[%s2162_s1 + $0x300] sm:$0xff]  ;;  %v414_v1 = vld [vmem:[%s2162_s1 + $0x388] sm:$0xff]  ;;  %v300_v7 = vld [vmem:[%s1803_s15 + $0x38] sm:$0xff] }
  0x37   : > { %554 = vmatpush.msrb.mxu2 %v407_v20  ;;  %573 = vmatpush.msrb.mxu3 %v424_v21  ;;  %v297_v2 = vld [vmem:[%s1803_s15 + $0x20] sm:$0xff]  ;;  %v298_v6 = vld [vmem:[%s1803_s15 + $0x28] sm:$0xff]  ;;  %s589_s15 = scalar_lea.vmem [#allocation2], %s1260_s10 }
  0x38   : > { %515 = vmatpush.msrb.mxu0 %v374_v22  ;;  %534 = vmatpush.msrb.mxu1 %v391_v23  ;;  %v381_v4 = vld [vmem:[%s2162_s1 + $0x280] sm:$0xff] }
  0x39   : > { %555 = vmatpush.msrb.mxu2 %v406_v24  ;;  %574 = vmatpush.msrb.mxu3 %v423_v25  ;;  %v413_v5 = vld [vmem:[%s2162_s1 + $0x380] sm:$0xff] }
  0x3a   : > { %516 = vmatpush.msrb.mxu0 %v373_v26  ;;  %535 = vmatpush.msrb.mxu1 %v390_v27 }
  0x3b   : > { %556 = vmatpush.msrb.mxu2 %v405_v28  ;;  %575 = vmatpush.msrb.mxu3 %v422_v29 }
  0x3c   : > { %517 = vmatpush.msrb.mxu0 %v372_v30  ;;  %536 = vmatpush.msrb.mxu1 %v389_v31 }
  0x3d   : > { %557 = vmatpush.msrb.mxu2 %v404_v32  ;;  %576 = vmatpush.msrb.mxu3 %v421_v33 }
  0x3e   : > { %518 = vmatpush.msrb.mxu0 %v371_v34  ;;  %537 = vmatpush.msrb.mxu1 %v388_v35 }
  0x3f   : > { %558 = vmatpush.msrb.mxu2 %v403_v36  ;;  %577 = vmatpush.msrb.mxu3 %v420_v37 }
  0x40   : > { %519 = vmatpush.msrb.mxu0 %v370_v38  ;;  %538 = vmatpush.msrb.mxu1 %v387_v39 }
  0x41   : > { %559 = vmatpush.msrb.mxu2 %v402_v40  ;;  %578 = vmatpush.msrb.mxu3 %v419_v41 }
  0x42   : > { %485 = vmatmul.f32.vlgmr.msra.gmra.mxu2 %v295_v42  ;;  %520 = vmatpush.msrb.mxu0 %v369_v43 }
  0x43   : > { %539 = vmatpush.msrb.mxu1 %v386_v44  ;;  %560 = vmatpush.msrb.mxu2 %v401_v45 }
  0x44   : > { %579 = vmatpush.msrb.mxu3 %v418_v46  ;;  %445 = vmatmul.f32.vlgmr.msra.gmra.mxu0 %v293_v47 }
  0x45   : > { %505 = vmatmul.f32.vlgmr.msra.gmra.mxu3 %v296_v48  ;;  %521 = vmatpush.msrb.mxu0 %v368_v49 }
  0x46   : > { %540 = vmatpush.msrb.mxu1 %v385_v50  ;;  %561 = vmatpush.msrb.mxu2 %v400_v51 }
  0x47   : > { %580 = vmatpush.msrb.mxu3 %v417_v52  ;;  %465 = vmatmul.f32.vlgmr.msra.gmra.mxu1 %v294_v53 }
  0x48   : > { %522 = vmatpush.msrb.mxu0 %v367_v54  ;;  %541 = vmatpush.msrb.mxu1 %v384_v55 }
  0x49   : > { %562 = vmatpush.msrb.mxu2 %v399_v56  ;;  %581 = vmatpush.msrb.mxu3 %v416_v57 }
  0x4a   : > { %523 = vmatpush.msrb.mxu0 %v366_v58  ;;  %542 = vmatpush.msrb.mxu1 %v383_v59 }
  0x4b   : > { %563 = vmatpush.msrb.mxu2 %v398_v60  ;;  %582 = vmatpush.msrb.mxu3 %v415_v61 }
  0x4c   : > { %524 = vmatpush.msrb.mxu0 %v365_v62  ;;  %543 = vmatpush.msrb.mxu1 %v382_v63 }
  0x4d   : > { %564 = vmatpush.msrb.mxu2 %v397_v0  ;;  %583 = vmatpush.msrb.mxu3 %v414_v1 }
  0x4e   : > { %525 = vmatmul.f32.vlgmr.msrb.gmra.mxu0 %v297_v2  ;;  %565 = vmatmul.f32.vlgmr.msrb.gmra.mxu2 %v299_v3 }
  0x4f   : > { %544 = vmatpush.msrb.mxu1 %v381_v4  ;;  %584 = vmatpush.msrb.mxu3 %v413_v5 }
  0x50   : > { %545 = vmatmul.f32.vlgmr.msrb.gmra.mxu1 %v298_v6  ;;  %585 = vmatmul.f32.vlgmr.msrb.gmra.mxu3 %v300_v7 }
  0xc1   : > { %v446_v8 = vpop.f32.mrf.mxu0 }
  0xc4   : > { %v466_v9 = vpop.f32.mrf.mxu1 }
  0xc5   : > { %v467_v10 = vadd.f32 %v466_v9, %v446_v8  ;;  %v486_v11 = vpop.f32.mrf.mxu2 }
  0xc7   : > { %v487_v12 = vadd.f32 %v486_v11, %v467_v10 }
  0xc8   : > { %v506_v13 = vpop.f32.mrf.mxu3 }
  0xc9   : > { %v507_v14 = vadd.f32 %v506_v13, %v487_v12 }
  0xcb   : > { %v526_v15 = vpop.f32.mrf.mxu0 }
  0xcc   : > { %v527_v16 = vadd.f32 %v526_v15, %v507_v14 }
  0xcd   : > { %v546_v17 = vpop.f32.mrf.mxu1 }
  0xce   : > { %v547_v18 = vadd.f32 %v546_v17, %v527_v16 }
  0xd1   : > { %v566_v19 = vpop.f32.mrf.mxu2 }
  0xd2   : > { %v567_v20 = vadd.f32 %v566_v19, %v547_v18  ;;  %595 = sbr.rel (%p1261_p4) target bundleno = 813 (0x32d), region = 56 }
  0xd3   : > { %v586_v21 = vpop.f32.mrf.mxu3 }
  0xd4   : > { %v587_v22 = vadd.f32 %v586_v21, %v567_v20 }
  0xd6   : > { %591 = vst.msk [vmem:[%s589_s15] sm:$0xff] %vm590_vm0, %v587_v22 }
  0xd7   : > { %v1420_v26 = vmov 2   ;;  %v1421_v27 = vmov 0   ;;  %v1422_v32 = vmov 32.0   ;;  %v1348_v15 = vld [vmem:[%s2165_s4] ss:$0 sm:$0xff] }
  0xd8   : > { %1326 = vset.pattern.permute.xlu2 %v1420_v26  ;;  %1324 = vset.pattern.permute.xlu1 %v1421_v27  ;;  %1352 = vrcp.f32 %v1422_v32  ;;  %v1349_v18 = vld [vmem:[%s2166_s5] ss:$0 sm:$0xff] }
  0xd9   : > { %1322 = vset.pattern.permute.xlu0 %v1421_v27 }
  0xdd   : > { %v596_v23 = vld [vmem:[#allocation2] sm:$0xff]  ;;  %v597_v24 = vld [vmem:[#allocation2 + $0x8] sm:$0xff]  ;;  %v598_v25 = vld [vmem:[#allocation2 + $0x10] sm:$0xff] }
  0xde   : > { %v599_v28 = vld [vmem:[#allocation2 + $0x18] sm:$0xff]  ;;  %v621_v29 = vsel %vm590_vm0, %v596_v23, 0.0  ;;  %v622_v30 = vsel %vm590_vm0, %v597_v24, 0.0  ;;  %v624_v31 = vsel %vm590_vm0, %v598_v25, 0.0  ;;  %v1353_v37 = vpop.eup %1352 }
  0xdf   : > { %v623_v33 = vadd.f32 %v622_v30, %v621_v29  ;;  %v626_v34 = vsel %vm590_vm0, %v599_v28, 0.0  ;;  %v635_v39 = vmul.f32 32.0, %v1353_v37  ;;  %vm639_vm1 = vweird.f32 %v1353_v37 }
  0xe1   : > { %v625_v35 = vadd.f32 %v624_v31, %v623_v33  ;;  %v636_v41 = vsub.f32 1.0, %v635_v39 }
  0xe3   : > { %v627_v36 = vadd.f32 %v626_v34, %v625_v35  ;;  %v637_v43 = vmul.f32 %v1353_v37, %v636_v41 }
  0xe5   : > { %v628_v38 = vrot.slane %v627_v36, 4  ;;  %v638_v45 = vadd.f32 %v1353_v37, %v637_v43 }
  0xe7   : > { %v629_v40 = vadd.f32 %v628_v38, %v627_v36  ;;  %v640_v47 = vsel %vm639_vm1, %v1353_v37, %v638_v45 }
  0xe9   : > { %v630_v42 = vrot.slane %v629_v40, 2 }
  0xeb   : > { %v631_v44 = vadd.f32 %v630_v42, %v629_v40 }
  0xed   : > { %v632_v46 = vrot.slane %v631_v44, 1 }
  0xef   : > { %v633_v48 = vadd.f32 %v632_v46, %v631_v44 }
  0xf1   : > { %v641_v49 = vmul.f32 %v640_v47, %v633_v48 }
  0xf3   : > { %v642_v50 = vsub.f32 %v596_v23, %v641_v49  ;;  %v643_v51 = vsub.f32 %v597_v24, %v641_v49  ;;  %v644_v52 = vsub.f32 %v598_v25, %v641_v49  ;;  %v645_v53 = vsub.f32 %v599_v28, %v641_v49 }
  0xf5   : > { %v650_v54 = vmul.f32 %v642_v50, %v642_v50  ;;  %v651_v55 = vmul.f32 %v643_v51, %v643_v51  ;;  %v652_v56 = vmul.f32 %v644_v52, %v644_v52  ;;  %v653_v57 = vmul.f32 %v645_v53, %v645_v53 }
  0xf7   : > { %v654_v58 = vsel %vm590_vm0, %v650_v54, 0.0  ;;  %v655_v59 = vsel %vm590_vm0, %v651_v55, 0.0  ;;  %v657_v60 = vsel %vm590_vm0, %v652_v56, 0.0  ;;  %v659_v62 = vsel %vm590_vm0, %v653_v57, 0.0 }
  0xf8   : > { %v656_v61 = vadd.f32 %v655_v59, %v654_v58 }
  0xfa   : > { %v658_v63 = vadd.f32 %v657_v60, %v656_v61 }
  0xfc   : > { %v660_v0 = vadd.f32 %v659_v62, %v658_v63 }
  0xfe   : > { %v661_v1 = vrot.slane %v660_v0, 4 }
 0x100   : > { %v662_v2 = vadd.f32 %v661_v1, %v660_v0 }
 0x102   : > { %v663_v3 = vrot.slane %v662_v2, 2 }
 0x104   : > { %v664_v4 = vadd.f32 %v663_v3, %v662_v2 }
 0x106   : > { %v665_v5 = vrot.slane %v664_v4, 1 }
 0x108   : > { %v666_v6 = vadd.f32 %v665_v5, %v664_v4 }
 0x10a   : > { %v667_v7 = vmul.f32 %v666_v6, %v640_v47 }
 0x10c   : > { %v668_v8 = vadd.f32 1e-05, %v667_v7 }
 0x10e   : > { %1354 = vrsqrt.f32 %v668_v8  ;;  %vm675_vm2 = vweird.f32 %v668_v8 }
 0x114   : > { %v1355_v9 = vpop.eup %1354 }
 0x115   : > { %v670_v10 = vmul.f32 %v1355_v9, %v668_v8  ;;  %vm676_vm3 = vweird.f32 %v1355_v9 }
 0x116   : > { %vm677_vm4 = vmor %vm675_vm2, %vm676_vm3 }
 0x117   : > { %v671_v11 = vmul.f32 %v1355_v9, %v670_v10 }
 0x119   : > { %v672_v12 = vmul.f32 0.5, %v671_v11 }
 0x11b   : > { %v673_v13 = vsub.f32 1.5, %v672_v12 }
 0x11d   : > { %v674_v14 = vmul.f32 %v1355_v9, %v673_v13 }
 0x11f   : > { %v678_v16 = vsel %vm677_vm4, %v1355_v9, %v674_v14 }
 0x120   : > { %v682_v17 = vmul.f32 %v678_v16, %v645_v53  ;;  %v681_v19 = vmul.f32 %v678_v16, %v644_v52  ;;  %v680_v20 = vmul.f32 %v678_v16, %v643_v51  ;;  %v679_v21 = vmul.f32 %v678_v16, %v642_v50 }
 0x122   : > { %v690_v22 = vmul.f32 %v1348_v15, %v682_v17  ;;  %v689_v23 = vmul.f32 %v1348_v15, %v681_v19  ;;  %v688_v24 = vmul.f32 %v1348_v15, %v680_v20  ;;  %v687_v25 = vmul.f32 %v1348_v15, %v679_v21 }
 0x124   : > { %v1911_v28 = vadd.f32 %v1349_v18, %v690_v22  ;;  %v1913_v29 = vadd.f32 %v1349_v18, %v689_v23  ;;  %v1915_v30 = vadd.f32 %v1349_v18, %v688_v24  ;;  %v1917_v31 = vadd.f32 %v1349_v18, %v687_v25 }
 0x126   : > { %v1920_v32 = vmul.f32 0.70710677, %v1911_v28  ;;  %v1923_v33 = vmul.f32 0.70710677, %v1913_v29  ;;  %v1926_v34 = vmul.f32 0.70710677, %v1915_v30 }
 0x127   : > { %v1929_v35 = vmul.f32 0.70710677, %v1917_v31 }
 0x128   : > { %v718_v36 = vand.u32 2147483647, %v1920_v32  ;;  %v717_v37 = vand.u32 2147483647, %v1923_v33  ;;  %v1934_v38 = vand.u32 2147483647, %v1926_v34 }
 0x129   : > { %v1937_v39 = vand.u32 2147483647, %v1929_v35 }
 0x12a   : > { %v722_v40 = vmul.f32 0.3275911, %v718_v36  ;;  %v721_v41 = vmul.f32 0.3275911, %v717_v37  ;;  %v720_v42 = vmul.f32 0.3275911, %v1934_v38 }
 0x12b   : > { %v719_v45 = vmul.f32 0.3275911, %v1937_v39  ;;  %v826_v48 = vsub.f32 0.0, %v718_v36  ;;  %v825_v57 = vsub.f32 0.0, %v717_v37 }
 0x12c   : > { %v726_v43 = vadd.f32 1.0, %v722_v40  ;;  %v725_v44 = vadd.f32 1.0, %v721_v41  ;;  %v724_v46 = vadd.f32 1.0, %v720_v42 }
 0x12d   : > { %v723_v47 = vadd.f32 1.0, %v719_v45  ;;  %v830_v59 = vmul.f32 %v826_v48, %v718_v36  ;;  %v829_v20 = vmul.f32 %v825_v57, %v717_v37  ;;  %v824_v37 = vsub.f32 0.0, %v1934_v38 }
 0x12e   : > { %1356 = vrcp.f32 %v726_v43  ;;  %v781_v50 = vand.u32 2147483647, %v726_v43  ;;  %v783_v53 = vand.u32 2147483648, %v726_v43  ;;  %v766_v54 = vand.u32 2147483647, %v725_v44 }
 0x12f   : > { %1358 = vrcp.f32 %v725_v44  ;;  %v768_v56 = vand.u32 2147483648, %v725_v44  ;;  %vm777_vm5 = vweird.f32 %v726_v43  ;;  %vm762_vm8 = vweird.f32 %v725_v44 }
 0x130   : > { %1360 = vrcp.f32 %v724_v46  ;;  %vm1941_vm7 = vcmp.eq.f32.partialorder %v781_v50, 8.507059e+37  ;;  %v784_v0 = vor.u32 1.1754944e-38, %v783_v53  ;;  %vm1945_vm10 = vcmp.eq.f32.partialorder %v766_v54, 8.507059e+37 }
 0x131   : > { %1362 = vrcp.f32 %v723_v47  ;;  %vm747_vm11 = vweird.f32 %v724_v46  ;;  %v769_v5 = vor.u32 1.1754944e-38, %v768_v56  ;;  %v751_v7 = vand.u32 2147483647, %v724_v46 }
 0x132   : > { %v753_v10 = vand.u32 2147483648, %v724_v46  ;;  %v738_v12 = vand.u32 2147483648, %v723_v47  ;;  %vm732_vm15 = vweird.f32 %v723_v47  ;;  %v736_v17 = vand.u32 2147483647, %v723_v47 }
 0x133   : > { %vm752_vm2 = vcmp.eq.f32.partialorder %v751_v7, 8.507059e+37  ;;  %v828_v56 = vmul.f32 %v824_v37, %v1934_v38 }
 0x134   : > { %v1357_v49 = vpop.eup %1356  ;;  %v754_v25 = vor.u32 1.1754944e-38, %v753_v10  ;;  %v739_v42 = vor.u32 1.1754944e-38, %v738_v12  ;;  %vm737_vm4 = vcmp.eq.f32.partialorder %v736_v17, 8.507059e+37  ;;  %v823_v12 = vsub.f32 0.0, %v1937_v39 }
 0x135   : > { %v1359_v51 = vpop.eup %1358  ;;  %v773_v52 = vmul.f32 %v1357_v49, %v726_v43  ;;  %vm778_vm6 = vweird.f32 %v1357_v49 }
 0x136   : > { %v758_v55 = vmul.f32 %v1359_v51, %v725_v44  ;;  %vm763_vm9 = vweird.f32 %v1359_v51  ;;  %v1361_v62 = vpop.eup %1360  ;;  %vm1949_vm12 = vmor %vm777_vm5, %vm778_vm6  ;;  %vm710_vm5 = vcmp.ge.f32.partialorder %v1920_v32, 0.0  ;;  %vm709_vm6 = vcmp.ge.f32.partialorder %v1923_v33, 0.0 }
 0x137   : > { %v774_v58 = vsub.f32 1.0, %v773_v52  ;;  %v1363_v2 = vpop.eup %1362  ;;  %v743_v6 = vmul.f32 %v1361_v62, %v724_v46  ;;  %vm1953_vm13 = vmor %vm762_vm8, %vm763_vm9  ;;  %vm748_vm14 = vweird.f32 %v1361_v62  ;;  %v702_v33 = vmul.f32 0.5, %v1911_v28 }
 0x138   : > { %v759_v61 = vsub.f32 1.0, %v758_v55  ;;  %v728_v11 = vmul.f32 %v1363_v2, %v723_v47  ;;  %vm733_vm0 = vweird.f32 %v1363_v2  ;;  %vm1966_vm1 = vmor %vm747_vm11, %vm748_vm14  ;;  %v835_v55 = vmul.f32 1.442695, %v829_v20 }
 0x139   : > { %v775_v63 = vmul.f32 %v1357_v49, %v774_v58  ;;  %v744_v14 = vsub.f32 1.0, %v743_v6  ;;  %vm734_vm3 = vmor %vm732_vm15, %vm733_vm0  ;;  %v1423_v20 = vmov -1.0   ;;  %vm707_vm8 = vcmp.ge.f32.partialorder %v1929_v35, 0.0 }
 0x13a   : > { %v760_v4 = vmul.f32 %v1359_v51, %v759_v61  ;;  %v729_v16 = vsub.f32 1.0, %v728_v11  ;;  %v1426_v35 = vmov 4   ;;  %vm1091_vm9 = vcmask 261120  }
 0x13b   : > { %v776_v8 = vadd.f32 %v1357_v49, %v775_v63  ;;  %v745_v21 = vmul.f32 %v1361_v62, %v744_v14 }
 0x13c   : > { %v761_v13 = vadd.f32 %v1359_v51, %v760_v4  ;;  %v730_v36 = vmul.f32 %v1363_v2, %v729_v16 }
 0x13d   : > { %v780_v15 = vsel %vm1949_vm12, %v1357_v49, %v776_v8  ;;  %v746_v41 = vadd.f32 %v1361_v62, %v745_v21  ;;  %v714_v21 = vsel %vm710_vm5, 1.0, %v1423_v20 }
 0x13e   : > { %v785_v18 = vsel %vm1941_vm7, %v784_v0, %v780_v15  ;;  %v765_v19 = vsel %vm1953_vm13, %v1359_v51, %v761_v13  ;;  %v731_v44 = vadd.f32 %v1363_v2, %v730_v36  ;;  %v837_v51 = vmul.f32 1.442695, %v830_v59 }
 0x13f   : > { %v790_v22 = vmul.f32 1.0614054, %v785_v18  ;;  %v770_v23 = vsel %vm1945_vm10, %v769_v5, %v765_v19  ;;  %v750_v46 = vsel %vm1966_vm1, %v1361_v62, %v746_v41  ;;  %v833_v59 = vmul.f32 1.442695, %v828_v56 }
 0x140   : > { %v789_v40 = vmul.f32 1.0614054, %v770_v23  ;;  %v755_v49 = vsel %vm752_vm2, %v754_v25, %v750_v46  ;;  %v735_v50 = vsel %vm734_vm3, %v1363_v2, %v731_v44  ;;  %1364 = vpow2.f32 %v837_v51 }
 0x141   : > { %v794_v43 = vadd.f32 -1.4531521, %v790_v22  ;;  %v788_v53 = vmul.f32 1.0614054, %v755_v49  ;;  %v1974_v54 = vsel %vm737_vm4, %v739_v42, %v735_v50  ;;  %1366 = vpow2.f32 %v835_v55 }
 0x142   : > { %v793_v45 = vadd.f32 -1.4531521, %v789_v40  ;;  %v787_v57 = vmul.f32 1.0614054, %v1974_v54  ;;  %1368 = vpow2.f32 %v833_v59  ;;  %v827_v25 = vmul.f32 %v823_v12, %v1937_v39 }
 0x143   : > { %v798_v48 = vmul.f32 %v794_v43, %v785_v18  ;;  %v792_v60 = vadd.f32 -1.4531521, %v788_v53  ;;  %v713_v41 = vsel %vm709_vm6, 1.0, %v1423_v20  ;;  %vm708_vm7 = vcmp.ge.f32.partialorder %v1926_v34, 0.0 }
 0x144   : > { %v797_v52 = vmul.f32 %v793_v45, %v770_v23  ;;  %v791_v63 = vadd.f32 -1.4531521, %v787_v57  ;;  %v701_v43 = vmul.f32 0.5, %v1913_v29  ;;  %v831_v45 = vmul.f32 1.442695, %v827_v25 }
 0x145   : > { %v802_v47 = vadd.f32 1.4214138, %v798_v48  ;;  %v796_v0 = vmul.f32 %v792_v60, %v755_v49  ;;  %v712_v39 = vsel %vm708_vm7, 1.0, %v1423_v20  ;;  %v700_v29 = vmul.f32 0.5, %v1915_v30 }
 0x146   : > { %v801_v58 = vadd.f32 1.4214138, %v797_v52  ;;  %v795_v2 = vmul.f32 %v791_v63, %v1974_v54  ;;  %v1365_v9 = vpop.eup %1364  ;;  %1370 = vpow2.f32 %v831_v45  ;;  %v1424_v57 = vmov 1  }
 0x147   : > { %v806_v61 = vmul.f32 %v802_v47, %v785_v18  ;;  %v800_v4 = vadd.f32 1.4214138, %v796_v0  ;;  %v1367_v13 = vpop.eup %1366  ;;  %v699_v63 = vmul.f32 0.5, %v1917_v31  ;;  %v1429_v31 = vmov 6  }
 0x148   : > { %v805_v62 = vmul.f32 %v801_v58, %v770_v23  ;;  %v799_v6 = vadd.f32 1.4214138, %v795_v2  ;;  %v1369_v36 = vpop.eup %1368  ;;  %vm1115_vm10 = vcmask 58368  }
 0x149   : > { %v810_v1 = vadd.f32 -0.28449672, %v806_v61  ;;  %v804_v38 = vmul.f32 %v800_v4, %v755_v49  ;;  %v1425_v61 = vmov 3  }
 0x14a   : > { %v809_v3 = vadd.f32 -0.28449672, %v805_v62  ;;  %v803_v15 = vmul.f32 %v799_v6, %v1974_v54 }
 0x14b   : > { %v814_v5 = vmul.f32 %v810_v1, %v785_v18  ;;  %v808_v11 = vadd.f32 -0.28449672, %v804_v38 }
 0x14c   : > { %v813_v7 = vmul.f32 %v809_v3, %v770_v23  ;;  %v807_v32 = vadd.f32 -0.28449672, %v803_v15  ;;  %v1371_v55 = vpop.eup %1370 }
 0x14d   : > { %v818_v8 = vadd.f32 0.2548296, %v814_v5  ;;  %v812_v17 = vmul.f32 %v808_v11, %v755_v49 }
 0x14e   : > { %v817_v10 = vadd.f32 0.2548296, %v813_v7  ;;  %v811_v48 = vmul.f32 %v807_v32, %v1974_v54  ;;  %v1264_v32 = vld [vmem:[%s2163_s2 + $0x30] sm:$0xff] }
 0x14f   : > { %v822_v14 = vmul.f32 %v818_v8, %v785_v18  ;;  %v816_v24 = vadd.f32 0.2548296, %v812_v17  ;;  %v862_v17 = vld [vmem:[%s2163_s2 + $0x18] sm:$0xff] }
 0x150   : > { %v821_v16 = vmul.f32 %v817_v10, %v770_v23  ;;  %v815_v28 = vadd.f32 0.2548296, %v811_v48  ;;  %v1268_v48 = vld [vmem:[%s2163_s2 + $0x50] sm:$0xff] }
 0x151   : > { %v842_v19 = vmul.f32 %v1365_v9, %v822_v14  ;;  %v820_v42 = vmul.f32 %v816_v24, %v755_v49 }
 0x152   : > { %v841_v22 = vmul.f32 %v1367_v13, %v821_v16  ;;  %v819_v47 = vmul.f32 %v815_v28, %v1974_v54  ;;  %v711_v54 = vsel %vm707_vm8, 1.0, %v1423_v20  ;;  %v1281_v28 = vld [vmem:[%s2163_s2 + $0xb8] sm:$0xff] }
 0x153   : > { %v846_v40 = vsub.f32 1.0, %v842_v19  ;;  %v840_v44 = vmul.f32 %v1369_v36, %v820_v42  ;;  %v1265_v19 = vld [vmem:[%s2163_s2 + $0x38] sm:$0xff] }
 0x154   : > { %v845_v18 = vsub.f32 1.0, %v841_v22  ;;  %v839_v58 = vmul.f32 %v1371_v55, %v819_v47  ;;  %v1269_v36 = vld [vmem:[%s2163_s2 + $0x58] sm:$0xff] }
 0x155   : > { %v850_v23 = vmul.f32 %v846_v40, %v714_v21  ;;  %v844_v51 = vsub.f32 1.0, %v840_v44  ;;  %v1273_v40 = vld [vmem:[%s2163_s2 + $0x78] sm:$0xff] }
 0x156   : > { %v849_v37 = vmul.f32 %v845_v18, %v713_v41  ;;  %v843_v30 = vsub.f32 1.0, %v839_v58  ;;  %v1277_v42 = vld [vmem:[%s2163_s2 + $0x98] sm:$0xff]  ;;  %v1271_v58 = vld [vmem:[%s2163_s2 + $0x68] sm:$0xff] }
 0x157   : > { %v854_v46 = vadd.f32 1.0, %v850_v23  ;;  %v848_v34 = vmul.f32 %v844_v51, %v712_v39  ;;  %v860_v39 = vld [vmem:[%s2163_s2 + $0x8] sm:$0xff] }
 0x158   : > { %v853_v50 = vadd.f32 1.0, %v849_v37  ;;  %v847_v60 = vmul.f32 %v843_v30, %v711_v54  ;;  %v1263_v37 = vld [vmem:[%s2163_s2 + $0x28] sm:$0xff] }
 0x159   : > { %v1991_v52 = vmul.f32 %v854_v46, %v702_v33  ;;  %v852_v49 = vadd.f32 1.0, %v848_v34 }
 0x15a   : > { %v1993_v53 = vmul.f32 %v853_v50, %v701_v43  ;;  %v851_v62 = vadd.f32 1.0, %v847_v60  ;;  %v861_v43 = vld [vmem:[%s2163_s2 + $0x10] sm:$0xff] }
 0x15b   : > { %934 = vperm.xlu2 %1326, %v1991_v52   ;;  %880 = vperm.xlu0 %1322, %v1991_v52   ;;  %v2000_v56 = vmul.f32 %v852_v49, %v700_v29 }
 0x15c   : > { %875 = vperm.xlu1 %1324, %v1993_v53   ;;  %v855_v0 = vmul.f32 %v851_v62, %v699_v63  ;;  %v1289_v62 = vld [vmem:[%s2163_s2 + $0xf8] sm:$0xff] }
 0x163   : > { %1327 = vset.pattern.permute.xlu2 %v1421_v27  ;;  %1323 = vset.pattern.permute.xlu0 %v1424_v57 }
 0x164   : > { %1325 = vset.pattern.permute.xlu1 %v1424_v57  ;;  %905 = vperm.xlu0 %1323, %v1991_v52  }
 0x165   : > { %901 = vperm.xlu1 %1325, %v1993_v53   ;;  %870 = vperm.xlu2 %1327, %v2000_v56  }
 0x16c   : > { %1329 = vset.pattern.permute.xlu0 %v1425_v61 }
 0x16d   : > { %897 = vperm.xlu1 %1325, %v2000_v56   ;;  %1328 = vset.pattern.permute.xlu2 %v1420_v26 }
 0x16e   : > { %963 = vperm.xlu0 %1329, %v1991_v52   ;;  %930 = vperm.xlu2 %1328, %v1993_v53  }
 0x175   : > { %1330 = vset.pattern.permute.xlu1 %v1421_v27  ;;  %v1427_v27 = vmov 5  }
 0x176   : > { %1334 = vset.pattern.permute.xlu0 %v1426_v35  ;;  %1331 = vset.pattern.permute.xlu2 %v1424_v57  ;;  %v1272_v57 = vld [vmem:[%s2163_s2 + $0x70] sm:$0xff] }
 0x177   : > { %865 = vperm.xlu1 %1330, %v855_v0   ;;  %992 = vperm.xlu0 %1334, %v1991_v52  }
 0x178   : > { %893 = vperm.xlu2 %1331, %v855_v0  }
 0x17f   : > { %1332 = vset.pattern.permute.xlu1 %v1420_v26  ;;  %1337 = vset.pattern.permute.xlu0 %v1425_v61  ;;  %v1428_v26 = vmov 7  }
 0x180   : > { %1333 = vset.pattern.permute.xlu2 %v1425_v61  ;;  %926 = vperm.xlu1 %1332, %v2000_v56   ;;  %v1276_v61 = vld [vmem:[%s2163_s2 + $0x90] sm:$0xff] }
 0x181   : > { %959 = vperm.xlu2 %1333, %v1993_v53   ;;  %951 = vperm.xlu0 %1337, %v855_v0  }
 0x188   : > { %922 = vperm.xlu1 %1332, %v855_v0  }
 0x189   : > { %955 = vperm.xlu2 %1333, %v2000_v56   ;;  %1340 = vset.pattern.permute.xlu0 %v1427_v27 }
 0x18a   : > { %1013 = vperm.xlu0 %1340, %v2000_v56  }
 0x190   : > { %1335 = vset.pattern.permute.xlu1 %v1426_v35 }
 0x191   : > { %1336 = vset.pattern.permute.xlu2 %v1427_v27  ;;  %988 = vperm.xlu1 %1335, %v1993_v53  }
 0x192   : > { %1021 = vperm.xlu2 %1336, %v1991_v52   ;;  %1344 = vset.pattern.permute.xlu0 %v1428_v26 }
 0x193   : > { %1075 = vperm.xlu0 %1344, %v1993_v53  }
 0x199   : > { %984 = vperm.xlu1 %1335, %v2000_v56  }
 0x19a   : > { %1017 = vperm.xlu2 %1336, %v1993_v53  }
 0x1a1   : > { %1338 = vset.pattern.permute.xlu1 %v1429_v31 }
 0x1a2   : > { %1339 = vset.pattern.permute.xlu2 %v1426_v35  ;;  %1050 = vperm.xlu1 %1338, %v1991_v52  }
 0x1a3   : > { %980 = vperm.xlu2 %1339, %v855_v0  }
 0x1aa   : > { %1046 = vperm.xlu1 %1338, %v1993_v53  }
 0x1ab   : > { %1341 = vset.pattern.permute.xlu2 %v1428_v26 }
 0x1ac   : > { %1079 = vperm.xlu2 %1341, %v1991_v52   ;;  %v1267_v52 = vld [vmem:[%s2163_s2 + $0x48] sm:$0xff] }
 0x1b2   : > { %1342 = vset.pattern.permute.xlu1 %v1427_v27  ;;  %v1285_v27 = vld [vmem:[%s2163_s2 + $0xd8] sm:$0xff] }
 0x1b3   : > { %1009 = vperm.xlu1 %1342, %v855_v0  }
 0x1b4   : > { %1343 = vset.pattern.permute.xlu2 %v1429_v31 }
 0x1b5   : > { %1042 = vperm.xlu2 %1343, %v2000_v56   ;;  %v935_v1 = vpop.permute.xlu2 %934 }
 0x1b6   : > { %v940_v23 = vmul.f32 %v1269_v36, %v935_v1  ;;  %v1288_v36 = vld [vmem:[%s2163_s2 + $0xf0] sm:$0xff] }
 0x1bb   : > { %1345 = vset.pattern.permute.xlu1 %v1429_v31 }
 0x1bc   : > { %1038 = vperm.xlu1 %1345, %v855_v0  }
 0x1bd   : > { %1346 = vset.pattern.permute.xlu2 %v1428_v26 }
 0x1be   : > { %1071 = vperm.xlu2 %1346, %v2000_v56  }
 0x1bf   : > { %v871_v59 = vpop.permute.xlu2 %870 }
 0x1c0   : > { %v884_v49 = vmul.f32 %v871_v59, %v860_v39 }
 0x1c4   : > { %1347 = vset.pattern.permute.xlu1 %v1428_v26 }
 0x1c5   : > { %1067 = vperm.xlu1 %1347, %v855_v0   ;;  %v1275_v0 = vld [vmem:[%s2163_s2 + $0x88] sm:$0xff] }
 0x1c8   : > { %v931_v2 = vpop.permute.xlu2 %930 }
 0x1c9   : > { %v939_v47 = vmul.f32 %v1268_v48, %v931_v2 }
 0x1cd   : > { %v881_v38 = vpop.permute.xlu0 %880 }
 0x1ce   : > { %v876_v3 = vpop.permute.xlu1 %875  ;;  %v886_v24 = vmul.f32 %v881_v38, %v862_v17 }
 0x1cf   : > { %v885_v53 = vmul.f32 %v876_v3, %v861_v43 }
 0x1d2   : > { %v2030_v4 = vpop.permute.xlu2 %893 }
 0x1d6   : > { %v906_v11 = vpop.permute.xlu0 %905 }
 0x1d7   : > { %v902_v5 = vpop.permute.xlu1 %901  ;;  %v911_v25 = vmul.f32 %v1265_v19, %v906_v11 }
 0x1d8   : > { %v910_v45 = vmul.f32 %v1264_v32, %v902_v5  ;;  %v1280_v5 = vld [vmem:[%s2163_s2 + $0xb0] sm:$0xff] }
 0x1d9   : > { %v915_v41 = vadd.f32 %v911_v25, %v886_v24 }
 0x1da   : > { %v914_v55 = vadd.f32 %v910_v45, %v885_v53  ;;  %v1266_v53 = vld [vmem:[%s2163_s2 + $0x40] sm:$0xff] }
 0x1db   : > { %v960_v6 = vpop.permute.xlu2 %959  ;;  %v944_v50 = vadd.f32 %v940_v23, %v915_v41  ;;  %v1284_v41 = vld [vmem:[%s2163_s2 + $0xd0] sm:$0xff] }
 0x1dc   : > { %v943_v26 = vadd.f32 %v939_v47, %v914_v55  ;;  %v968_v31 = vmul.f32 %v1272_v57, %v960_v6  ;;  %v1270_v47 = vld [vmem:[%s2163_s2 + $0x60] sm:$0xff] }
 0x1df   : > { %v898_v7 = vpop.permute.xlu1 %897 }
 0x1e0   : > { %v964_v14 = vpop.permute.xlu0 %963  ;;  %v909_v34 = vmul.f32 %v1263_v37, %v898_v7 }
 0x1e1   : > { %v969_v44 = vmul.f32 %v1273_v40, %v964_v14  ;;  %v972_v14 = vadd.f32 %v968_v31, %v943_v26  ;;  %v1283_v40 = vld [vmem:[%s2163_s2 + $0xc8] sm:$0xff]  ;;  %v1430_v31 = vmov 2.0  }
 0x1e2   : > { %v913_v60 = vadd.f32 %v909_v34, %v884_v49  ;;  %1372 = vrcp.f32 %v1430_v31 }
 0x1e3   : > { %v956_v8 = vpop.permute.xlu2 %955  ;;  %v973_v29 = vadd.f32 %v969_v44, %v944_v50  ;;  %v1262_v50 = vld [vmem:[%s2163_s2 + $0x20] sm:$0xff] }
 0x1e4   : > { %v967_v1 = vmul.f32 %v1271_v58, %v956_v8  ;;  %v1274_v58 = vld [vmem:[%s2163_s2 + $0x80] sm:$0xff] }
 0x1e9   : > { %v2032_v9 = vpop.permute.xlu1 %865  ;;  %v993_v21 = vpop.permute.xlu0 %992 }
 0x1ea   : > { %v998_v51 = vmul.f32 %v1277_v42, %v993_v21 }
 0x1ec   : > { %v1022_v10 = vpop.permute.xlu2 %1021  ;;  %v1002_v30 = vadd.f32 %v998_v51, %v973_v29  ;;  %v859_v51 = vld [vmem:[%s2163_s2] sm:$0xff] }
 0x1ed   : > { %v1027_v54 = vmul.f32 %v1281_v28, %v1022_v10  ;;  %v908_v28 = vmul.f32 %v1262_v50, %v2030_v4  ;;  %v883_v29 = vmul.f32 %v2032_v9, %v859_v51  ;;  %v1278_v4 = vld [vmem:[%s2163_s2 + $0xa0] sm:$0xff] }
 0x1ee   : > { %v1351_v51 = vld [vmem:[%s2168_s7] ss:$0 sm:$0xff] }
 0x1ef   : > { %v1031_v2 = vadd.f32 %v1027_v54, %v1002_v30  ;;  %v912_v55 = vadd.f32 %v908_v28, %v883_v29  ;;  %v1282_v54 = vld [vmem:[%s2163_s2 + $0xc0] sm:$0xff] }
 0x1f2   : > { %v927_v12 = vpop.permute.xlu1 %926 }
 0x1f3   : > { %v2056_v33 = vpop.permute.xlu0 %951  ;;  %v938_v56 = vmul.f32 %v1267_v52, %v927_v12  ;;  %v1279_v12 = vld [vmem:[%s2163_s2 + $0xa8] sm:$0xff] }
 0x1f4   : > { %v1018_v13 = vpop.permute.xlu2 %1017  ;;  %v966_v57 = vmul.f32 %v1270_v47, %v2056_v33  ;;  %v1286_v33 = vld [vmem:[%s2163_s2 + $0xe0] sm:$0xff] }
 0x1f5   : > { %v942_v59 = vadd.f32 %v938_v56, %v913_v60  ;;  %v1026_v6 = vmul.f32 %v1280_v5, %v1018_v13  ;;  %v1287_v13 = vld [vmem:[%s2163_s2 + $0xe8] sm:$0xff] }
 0x1f7   : > { %v971_v17 = vadd.f32 %v967_v1, %v942_v59  ;;  %v1373_v1 = vpop.eup %1372 }
 0x1f8   : > { %v1124_v59 = vmul.f32 2.0, %v1373_v1  ;;  %vm1128_vm11 = vweird.f32 %v1373_v1 }
 0x1fa   : > { %v2034_v15 = vpop.permute.xlu1 %922 }
 0x1fb   : > { %v937_v49 = vmul.f32 %v1266_v53, %v2034_v15 }
 0x1fc   : > { %v1014_v63 = vpop.permute.xlu0 %1013 }
 0x1fd   : > { %v2036_v16 = vpop.permute.xlu2 %980  ;;  %v1025_v24 = vmul.f32 %v1279_v12, %v1014_v63  ;;  %v941_v56 = vadd.f32 %v937_v49, %v912_v55 }
 0x1fe   : > { %v995_v15 = vmul.f32 %v1274_v58, %v2036_v16  ;;  %v1090_v16 = vld [vmem:[%s2164_s3] sm:$0x3] }
 0x1ff   : > { %v970_v9 = vadd.f32 %v966_v57, %v941_v56 }
 0x203   : > { %v989_v22 = vpop.permute.xlu1 %988 }
 0x204   : > { %v997_v7 = vmul.f32 %v1276_v61, %v989_v22  ;;  %v999_v61 = vadd.f32 %v995_v15, %v970_v9 }
 0x205   : > { %v1076_v22 = vpop.permute.xlu0 %1075 }
 0x206   : > { %v1080_v18 = vpop.permute.xlu2 %1079  ;;  %v1001_v8 = vadd.f32 %v997_v7, %v972_v14  ;;  %v1084_v42 = vmul.f32 %v1288_v36, %v1076_v22 }
 0x207   : > { %v1085_v38 = vmul.f32 %v1289_v62, %v1080_v18 }
 0x208   : > { %v1030_v37 = vadd.f32 %v1026_v6, %v1001_v8 }
 0x20b   : > { %v985_v46 = vpop.permute.xlu1 %984 }
 0x20c   : > { %v996_v10 = vmul.f32 %v1275_v0, %v985_v46 }
 0x20e   : > { %v1000_v21 = vadd.f32 %v996_v10, %v971_v17 }
 0x20f   : > { %v1043_v35 = vpop.permute.xlu2 %1042 }
 0x210   : > { %v1029_v23 = vadd.f32 %v1025_v24, %v1000_v21  ;;  %v1054_v43 = vmul.f32 %v1283_v40, %v1043_v35 }
 0x212   : > { %v1058_v39 = vadd.f32 %v1054_v43, %v1029_v23 }
 0x214   : > { %v1051_v3 = vpop.permute.xlu1 %1050 }
 0x215   : > { %v1056_v11 = vmul.f32 %v1285_v27, %v1051_v3 }
 0x217   : > { %v1060_v19 = vadd.f32 %v1056_v11, %v1031_v2  ;;  %v1125_v2 = vsub.f32 1.0, %v1124_v59 }
 0x218   : > { %v1072_v32 = vpop.permute.xlu2 %1071 }
 0x219   : > { %v1089_v25 = vadd.f32 %v1085_v38, %v1060_v19  ;;  %v1083_v45 = vmul.f32 %v1287_v13, %v1072_v32  ;;  %v1126_v38 = vmul.f32 %v1373_v1, %v1125_v2 }
 0x21b   : > { %1107 = vmatpush.msra.mxu0 %v1089_v25  ;;  %v1087_v52 = vadd.f32 %v1083_v45, %v1058_v39  ;;  %v1127_v12 = vadd.f32 %v1373_v1, %v1126_v38  ;;  %v1350_v39 = vld [vmem:[%s2167_s6] ss:$0 sm:$0xff] }
 0x21c   : > { %v1047_v18 = vpop.permute.xlu1 %1046 }
 0x21d   : > { %v1055_v44 = vmul.f32 %v1284_v41, %v1047_v18  ;;  %v1129_v19 = vsel %vm1128_vm11, %v1373_v1, %v1127_v12 }
 0x21f   : > { %v1059_v46 = vadd.f32 %v1055_v44, %v1030_v37 }
 0x221   : > { %v1088_v48 = vadd.f32 %v1084_v42, %v1059_v46 }
 0x223   : > { %1108 = vmatpush.msra.mxu0 %v1088_v48 }
 0x225   : > { %1109 = vmatpush.msra.mxu0 %v1087_v52  ;;  %v1010_v34 = vpop.permute.xlu1 %1009 }
 0x226   : > { %v1024_v60 = vmul.f32 %v1278_v4, %v1010_v34 }
 0x228   : > { %v1028_v62 = vadd.f32 %v1024_v60, %v999_v61 }
 0x22e   : > { %v1039_v30 = vpop.permute.xlu1 %1038 }
 0x22f   : > { %v1053_v63 = vmul.f32 %v1282_v54, %v1039_v30 }
 0x231   : > { %v1057_v35 = vadd.f32 %v1053_v63, %v1028_v62 }
 0x237   : > { %v1068_v0 = vpop.permute.xlu1 %1067 }
 0x238   : > { %v1082_v27 = vmul.f32 %v1286_v33, %v1068_v0 }
 0x23a   : > { %v1086_v26 = vadd.f32 %v1082_v27, %v1057_v35 }
 0x23c   : > { %1110 = vmatpush.msra.mxu0 %v1086_v26 }
 0x23d   : > { %1290 = vmatmul.msk.f32.vlgmr.msra.gmra.mxu0 %vm1091_vm9, %v1090_v16 }
 0x2ba   : > { %v1112_v3 = vpop.f32.mrf.mxu0 }
 0x2bb   : > { %v1116_v5 = vsel %vm1115_vm10, %v1112_v3, 0.0 }
 0x2bc   : > { %v1117_v7 = vrot.slane %v1116_v5, 4 }
 0x2be   : > { %v1118_v10 = vadd.f32 %v1117_v7, %v1116_v5 }
 0x2c0   : > { %v1119_v11 = vrot.slane %v1118_v10, 2 }
 0x2c2   : > { %v1120_v14 = vadd.f32 %v1119_v11, %v1118_v10 }
 0x2c4   : > { %v1121_v17 = vrot.slane %v1120_v14, 1 }
 0x2c6   : > { %v1122_v6 = vadd.f32 %v1121_v17, %v1120_v14 }
 0x2c8   : > { %v1130_v8 = vmul.f32 %v1129_v19, %v1122_v6 }
 0x2ca   : > { %v1131_v21 = vsub.f32 %v1112_v3, %v1130_v8 }
 0x2cc   : > { %v1132_v24 = vmul.f32 %v1131_v21, %v1131_v21 }
 0x2ce   : > { %v1133_v25 = vsel %vm1115_vm10, %v1132_v24, 0.0 }
 0x2cf   : > { %v1134_v36 = vrot.slane %v1133_v25, 4 }
 0x2d1   : > { %v1135_v22 = vadd.f32 %v1134_v36, %v1133_v25 }
 0x2d3   : > { %v1136_v40 = vrot.slane %v1135_v22, 2 }
 0x2d5   : > { %v1137_v41 = vadd.f32 %v1136_v40, %v1135_v22 }
 0x2d7   : > { %v1138_v13 = vrot.slane %v1137_v41, 1 }
 0x2d9   : > { %v1139_v32 = vadd.f32 %v1138_v13, %v1137_v41 }
 0x2db   : > { %v1140_v18 = vmul.f32 %v1139_v32, %v1129_v19 }
 0x2dd   : > { %v1141_v42 = vadd.f32 1e-05, %v1140_v18 }
 0x2df   : > { %1374 = vrsqrt.f32 %v1141_v42  ;;  %vm1148_vm13 = vweird.f32 %v1141_v42 }
 0x2e5   : > { %v1375_v23 = vpop.eup %1374 }
 0x2e6   : > { %v1143_v43 = vmul.f32 %v1375_v23, %v1141_v42  ;;  %vm1149_vm12 = vweird.f32 %v1375_v23 }
 0x2e7   : > { %vm1150_vm14 = vmor %vm1148_vm13, %vm1149_vm12 }
 0x2e8   : > { %v1144_v37 = vmul.f32 %v1375_v23, %v1143_v43 }
 0x2ea   : > { %v1145_v44 = vmul.f32 0.5, %v1144_v37 }
 0x2ec   : > { %v1146_v45 = vsub.f32 1.5, %v1145_v44 }
 0x2ee   : > { %v1147_v46 = vmul.f32 %v1375_v23, %v1146_v45 }
 0x2f0   : > { %v1151_v48 = vsel %vm1150_vm14, %v1375_v23, %v1147_v46 }
 0x2f1   : > { %v1152_v50 = vmul.f32 %v1151_v48, %v1131_v21 }
 0x2f3   : > { %v1157_v52 = vmul.f32 %v1350_v39, %v1152_v50 }
 0x2f5   : > { %v1162_v53 = vadd.f32 %v1351_v51, %v1157_v52 }
 0x2f7   : > { %v1164_v34 = vmul.f32 0.70710677, %v1162_v53  ;;  %v1163_v38 = vmul.f32 0.5, %v1162_v53 }
 0x2f9   : > { %v1167_v28 = vand.u32 2147483647, %v1164_v34  ;;  %vm1165_vm3 = vcmp.ge.f32.partialorder %v1164_v34, 0.0 }
 0x2fa   : > { %v1166_v5 = vsel %vm1165_vm3, 1.0, %v1423_v20 }
 0x2fb   : > { %v1168_v29 = vmul.f32 0.3275911, %v1167_v28  ;;  %v1194_v60 = vsub.f32 0.0, %v1167_v28 }
 0x2fd   : > { %v1169_v49 = vadd.f32 1.0, %v1168_v29  ;;  %v1195_v33 = vmul.f32 %v1194_v60, %v1167_v28 }
 0x2ff   : > { %1376 = vrcp.f32 %v1169_v49  ;;  %v1181_v57 = vand.u32 2147483648, %v1169_v49  ;;  %v1179_v30 = vand.u32 2147483647, %v1169_v49  ;;  %vm1175_vm0 = vweird.f32 %v1169_v49 }
 0x300   : > { %v1196_v35 = vmul.f32 1.442695, %v1195_v33 }
 0x301   : > { %v1182_v9 = vor.u32 1.1754944e-38, %v1181_v57  ;;  %vm1180_vm2 = vcmp.eq.f32.partialorder %v1179_v30, 8.507059e+37 }
 0x302   : > { %1378 = vpow2.f32 %v1196_v35 }
 0x305   : > { %v1377_v47 = vpop.eup %1376 }
 0x306   : > { %v1171_v55 = vmul.f32 %v1377_v47, %v1169_v49  ;;  %vm1176_vm15 = vweird.f32 %v1377_v47 }
 0x307   : > { %vm1177_vm1 = vmor %vm1175_vm0, %vm1176_vm15 }
 0x308   : > { %v1172_v56 = vsub.f32 1.0, %v1171_v55  ;;  %v1379_v59 = vpop.eup %1378 }
 0x30a   : > { %v1173_v58 = vmul.f32 %v1377_v47, %v1172_v56 }
 0x30c   : > { %v1174_v4 = vadd.f32 %v1377_v47, %v1173_v58 }
 0x30e   : > { %v1178_v15 = vsel %vm1177_vm1, %v1377_v47, %v1174_v4 }
 0x30f   : > { %v1183_v54 = vsel %vm1180_vm2, %v1182_v9, %v1178_v15 }
 0x310   : > { %v1185_v61 = vmul.f32 1.0614054, %v1183_v54 }
 0x312   : > { %v1186_v63 = vadd.f32 -1.4531521, %v1185_v61 }
 0x314   : > { %v1187_v62 = vmul.f32 %v1186_v63, %v1183_v54 }
 0x316   : > { %v1188_v0 = vadd.f32 1.4214138, %v1187_v62 }
 0x318   : > { %v1189_v27 = vmul.f32 %v1188_v0, %v1183_v54 }
 0x31a   : > { %v1190_v26 = vadd.f32 -0.28449672, %v1189_v27 }
 0x31c   : > { %v1191_v16 = vmul.f32 %v1190_v26, %v1183_v54 }
 0x31e   : > { %v1192_v31 = vadd.f32 0.2548296, %v1191_v16 }
 0x320   : > { %v1193_v1 = vmul.f32 %v1192_v31, %v1183_v54 }
 0x322   : > { %v1198_v2 = vmul.f32 %v1379_v59, %v1193_v1 }
 0x324   : > { %v1199_v3 = vsub.f32 1.0, %v1198_v2 }
 0x326   : > { %v1200_v7 = vmul.f32 %v1199_v3, %v1166_v5 }
 0x328   : > { %v1201_v10 = vadd.f32 1.0, %v1200_v7 }
 0x32a   : > { %v1202_v11 = vmul.f32 %v1201_v10, %v1163_v38 }
 0x32c   : > { %1203 = vst.msk [vmem:[#allocation3] sm:$0x3] %vm1115_vm10, %v1202_v11 }
 0x32d PF: > { %p1300_p5 = scmp.eq.s32.totalorder %s1483_s28, 3  ;;  %s1431_s29 = smov [#allocation3]  }
 0x32e   : > { %s1210_s30 = sshll.u32 %s1431_s29, 4  ;;  %s1212_s10 = sshll.u32 %s2169_s8, 4  ;;  %s1211_s30 = int_to_ptr.vmem [resolvable:$true] %s1210_s30  ;;  %s1213_s10 = int_to_ptr.hbm [resolvable:$true] %s1212_s10 }
 0x32f   : > { %1297 = dma.vmem_to_hbm [thread:$0]  (%p1300_p5), %s1211_s30, 32, %s1213_s10, [#allocation4]  }
 0x330   : > { %1413 = dma.done.wait (%p1300_p5), [#allocation4], 32  }
 0x331   : > { %1415 = vsyncadd (%p1300_p5), [#allocation4], 4294967264 }
 0x332 PF: > { %s19_s27 = sadd.s32 1, %s1418_s27  }
 0x333   : > { %p16_p6 = scmp.ge.s32.totalorder %s19_s27, 6  }
 0x335   :  { %18 = sbr.rel (!%p16_p6) target bundleno = 1 (0x1), region = 91 }
 0x33a   :  { %1226 = vsyncpa [#allocation4], 1 }
 0x33b   :  { %1228 = vsyncpa [#allocation4 + $0x1], 1 }

</bundles_post_ra>
